<compile_context>
chip_gen: v7x
topology: tpu7x:2x2x1
jax: 0.10.0
libtpu: 0.0.40
codegen_flags: <defaults>
</compile_context>

<pallas_src>
import jax
import jax.numpy as jnp
from jax.experimental import pallas as pl
from jax.experimental.pallas import tpu as pltpu


def _round_up(n, m):
    return (n + m - 1) // m * m


def gru_rec_kernel(pre_ref, w_rzh_ref, w_gh_ref, h0_ref, out_ref, h_scr):
    """Recurrent (hidden-side) part of one GRU layer over a chunk of TT steps.

    pre_ref : (TT, Bp, 3*Hp) f32  precomputed x-side gate pre-activations
              laid out as [pre_r | pre_z | pre_g] along the last dim.
    w_rzh   : (Hp, 2*Hp) f32      [W_rh | W_zh] hidden-side weights (fused).
    w_gh    : (Hp, Hp)   f32      hidden-side weight of the candidate gate.
    h0_ref  : (Bp, Hp)   f32      initial hidden state (consumed at chunk 0).
    out_ref : (TT, Bp, Hp) f32    per-step hidden states (lane-dense).
    h_scr   : (Bp, Hp)   f32 VMEM recurrent state carried across grid steps.
    """
    @pl.when(pl.program_id(0) == 0)
    def _():
        h_scr[...] = h0_ref[...]

    TT = pre_ref.shape[0]
    Hp = h_scr.shape[-1]

    # Hoist the (grid-constant) weight loads out of the time loop.
    w_rzh = w_rzh_ref[...]
    w_gh = w_gh_ref[...]

    def step(tt, h):
        pre = pre_ref[tt]                                    # (Bp, 3*Hp)
        rz = jax.nn.sigmoid(
            pre[:, : 2 * Hp]
            + jnp.dot(h, w_rzh, preferred_element_type=jnp.float32))
        r = rz[:, :Hp]                                       # lane-aligned split
        z = rz[:, Hp:]
        g = jnp.tanh(
            pre[:, 2 * Hp:]
            + jnp.dot(r * h, w_gh, preferred_element_type=jnp.float32))
        h_new = z * h + (1.0 - z) * g
        out_ref[tt] = h_new
        return h_new

    h = jax.lax.fori_loop(0, TT, step, h_scr[...], unroll=True)
    h_scr[...] = h


def gru_layer(x, p, h0, *, time_chunk=16):
    """One GRU layer over the full sequence. x: (T,B,IC) -> out (T,B,H), hT (B,H)."""
    T, B, IC = x.shape
    H = h0.shape[-1]

    Hp = _round_up(H, 128)            # lane-dense hidden width
    Bp = _round_up(max(B, 8), 8)      # full f32 sublanes
    TT = min(time_chunk, T)           # timesteps per grid step
    Tp = _round_up(T, TT)
    pad_h = Hp - H

    f32 = jnp.float32
    xf = x.astype(f32)

    # ---- Hoisted input projections: one big matmul over all T*B rows (XLA). ----
    pre1 = jnp.einsum('tbi,ih->tbh', xf, p["w1x"].astype(f32)) + p["b1"].astype(f32)  # (T,B,2H)
    pre2 = jnp.einsum('tbi,ih->tbh', xf, p["w2x"].astype(f32)) + p["b2"].astype(f32)  # (T,B,H)
    pre_r, pre_z = pre1[..., :H], pre1[..., H:]

    def pad_last(a):
        return jnp.pad(a, ((0, 0), (0, 0), (0, pad_h)))

    pre = jnp.concatenate([pad_last(pre_r), pad_last(pre_z), pad_last(pre2)], axis=-1)
    pre = jnp.pad(pre, ((0, Tp - T), (0, Bp - B), (0, 0)))    # (Tp, Bp, 3*Hp)

    # ---- Hidden-side weights, padded to (Hp, *) and fused for r/z. ----
    w_rh = jnp.pad(p["w1h"][:, :H].astype(f32), ((0, pad_h), (0, pad_h)))
    w_zh = jnp.pad(p["w1h"][:, H:].astype(f32), ((0, pad_h), (0, pad_h)))
    w_rzh = jnp.concatenate([w_rh, w_zh], axis=1)             # (Hp, 2*Hp)
    w_gh = jnp.pad(p["w2h"].astype(f32), ((0, pad_h), (0, pad_h)))  # (Hp, Hp)
    h0p = jnp.pad(h0.astype(f32), ((0, Bp - B), (0, pad_h)))  # (Bp, Hp)

    out_pad = pl.pallas_call(
        gru_rec_kernel,
        out_shape=jax.ShapeDtypeStruct((Tp, Bp, Hp), jnp.float32),
        grid_spec=pltpu.PrefetchScalarGridSpec(
            num_scalar_prefetch=0,
            grid=(Tp // TT,),
            in_specs=[
                pl.BlockSpec((TT, Bp, 3 * Hp), lambda c: (c, 0, 0)),  # gate pre-acts
                pl.BlockSpec((Hp, 2 * Hp), lambda c: (0, 0)),         # [W_rh|W_zh]
                pl.BlockSpec((Hp, Hp), lambda c: (0, 0)),             # W_gh
                pl.BlockSpec((Bp, Hp), lambda c: (0, 0)),             # h0
            ],
            out_specs=pl.BlockSpec((TT, Bp, Hp), lambda c: (c, 0, 0)),
            scratch_shapes=[pltpu.VMEM((Bp, Hp), jnp.float32)],
        ),
        compiler_params=pltpu.CompilerParams(
            dimension_semantics=("arbitrary",)),
    )(pre, w_rzh, w_gh, h0p)

    out = out_pad[:T, :B, :H].astype(x.dtype)
    hT = out[T - 1]                    # final hidden state == last output step
    return out, hT


def init_gru_params(key, ic, hc, layer_num):
    """Deterministic init mirroring the PyTorch module:
       xavier_normal_ on linear weights, bias1=1, bias2=0.
       Weights are stored transposed vs. nn.Linear, i.e. (in, out)."""
    params = []
    for layer in range(layer_num):
        in_c = ic if layer == 0 else hc
        key, k1, k2 = jax.random.split(key, 3)
        fan_in = in_c + hc
        std1 = (2.0 / (fan_in + 2 * hc)) ** 0.5
        std2 = (2.0 / (fan_in + hc)) ** 0.5
        w1 = std1 * jax.random.normal(k1, (fan_in, 2 * hc), jnp.float32)
        w2 = std2 * jax.random.normal(k2, (fan_in, hc), jnp.float32)
        params.append(dict(
            w1x=w1[:in_c], w1h=w1[in_c:], b1=jnp.ones((1, 2 * hc), jnp.float32),
            w2x=w2[:in_c], w2h=w2[in_c:], b2=jnp.zeros((1, hc), jnp.float32),
        ))
    return params


def gru_forward(params, x, hiddens):
    """x: (T, B, ic); hiddens: (layer_num, 1, hc).
       Returns (out, (hs,)) matching the PyTorch module."""
    T, B, _ = x.shape
    h0_all = jnp.repeat(hiddens, B, axis=1)          # (L, B, H)
    cur = x
    hs = []
    for i, p in enumerate(params):
        cur, hT = gru_layer(cur, p, h0_all[i])
        hs.append(hT)
    return cur, (jnp.stack(hs, axis=0),)


def gru_forward_ref(params, x, hiddens):
    """Pure-JAX reference of the same computation (for sanity checking)."""
    T, B, _ = x.shape
    h0_all = jnp.repeat(hiddens, B, axis=1)
    lstm_input = x
    hs = []
    for i, p in enumerate(params):
        h = h0_all[i]
        H = h.shape[-1]
        outs = []
        for t in range(T):
            xt = lstm_input[t]
            pre1 = xt @ p["w1x"] + h @ p["w1h"] + p["b1"]
            r = jax.nn.sigmoid(pre1[:, :H])
            z = jax.nn.sigmoid(pre1[:, H:])
            g = jnp.tanh(xt @ p["w2x"] + (r * h) @ p["w2h"] + p["b2"])
            h = z * h + (1 - z) * g
            outs.append(h)
        lstm_input = jnp.stack(outs, axis=0)
        hs.append(h)
    return lstm_input, (jnp.stack(hs, axis=0),)


if __name__ == "__main__":
    T, B, IC, HC, L = 8, 2, 16, 32, 2

    key = jax.random.PRNGKey(0)
    kx, kp = jax.random.split(key)
    x = jax.random.normal(kx, (T, B, IC), jnp.float32)
    params = init_gru_params(kp, IC, HC, L)
    hiddens = jnp.zeros((L, 1, HC), jnp.float32)      # learn_init=False -> zeros

    out, (hs,) = jax.jit(gru_forward)(params, x, hiddens)
    out = jax.block_until_ready(out)
    hs = jax.block_until_ready(hs)

    out_ref, (hs_ref,) = gru_forward_ref(params, x, hiddens)

    assert out.shape == (T, B, HC)
    assert hs.shape == (L, B, HC)
    assert jnp.allclose(out, out_ref, atol=2e-5, rtol=2e-5)
    assert jnp.allclose(hs, hs_ref, atol=2e-5, rtol=2e-5)

    print("KERNEL_OK")
</pallas_src>

<mosaic_0001>
module attributes {stable_mosaic.version = 11 : i64} {
  func.func @gru_rec_kernel(%arg0: i32, %arg1: memref<8x8x384xf32, #tpu.memory_space<vmem>>, %arg2: memref<128x256xf32, #tpu.memory_space<vmem>>, %arg3: memref<128x128xf32, #tpu.memory_space<vmem>>, %arg4: memref<8x128xf32, #tpu.memory_space<vmem>>, %arg5: memref<8x8x128xf32, #tpu.memory_space<vmem>>, %arg6: memref<8x128xf32, #tpu.memory_space<vmem>>) attributes {dimension_semantics = [#tpu.dimension_semantics<arbitrary>], iteration_bounds = array<i64: 1>, scalar_prefetch = 0 : i64, scratch_operands = 1 : i64, tpu.core_type = #tpu.core_type<tc>, window_params = [{transform_indices = @transform_0, window_bounds = array<i64: 8, 8, 384>}, {pipeline_mode = #tpu.pipeline_mode<synchronous>, transform_indices = @transform_1, window_bounds = array<i64: 128, 256>}, {pipeline_mode = #tpu.pipeline_mode<synchronous>, transform_indices = @transform_2, window_bounds = array<i64: 128, 128>}, {pipeline_mode = #tpu.pipeline_mode<synchronous>, transform_indices = @transform_3, window_bounds = array<i64: 8, 128>}, {transform_indices = @transform_4, window_bounds = array<i64: 8, 8, 128>}]} {
    %c0_i32 = arith.constant 0 : i32
    %0 = arith.cmpi eq, %arg0, %c0_i32 : i32
    %1 = arith.extui %0 : i1 to i32
    %c0_i32_0 = arith.constant 0 : i32
    %2 = arith.cmpi ne, %1, %c0_i32_0 : i32
    scf.if %2 {
      %c0_72 = arith.constant 0 : index
      %c0_73 = arith.constant 0 : index
      %223 = vector.load %arg4[%c0_72, %c0_73] : memref<8x128xf32, #tpu.memory_space<vmem>>, vector<8x128xf32>
      %c0_74 = arith.constant 0 : index
      %c0_75 = arith.constant 0 : index
      %224 = vector.load %arg6[%c0_74, %c0_75] : memref<8x128xf32, #tpu.memory_space<vmem>>, vector<8x128xf32>
      tpu.vector_store %arg6[%c0_74, %c0_75], %223 {strides = array<i32>} : memref<8x128xf32, #tpu.memory_space<vmem>>, vector<8x128xf32>,
    } else {
    }
    %c0 = arith.constant 0 : index
    %c0_1 = arith.constant 0 : index
    %3 = vector.load %arg2[%c0, %c0_1] : memref<128x256xf32, #tpu.memory_space<vmem>>, vector<128x256xf32>
    %c0_2 = arith.constant 0 : index
    %c0_3 = arith.constant 0 : index
    %4 = vector.load %arg3[%c0_2, %c0_3] : memref<128x128xf32, #tpu.memory_space<vmem>>, vector<128x128xf32>
    %c0_4 = arith.constant 0 : index
    %c0_5 = arith.constant 0 : index
    %5 = vector.load %arg6[%c0_4, %c0_5] : memref<8x128xf32, #tpu.memory_space<vmem>>, vector<8x128xf32>
    %c0_i32_6 = arith.constant 0 : i32
    %6 = arith.index_cast %c0_i32_6 : i32 to index
    %c0_7 = arith.constant 0 : index
    %c0_8 = arith.constant 0 : index
    %7 = vector.load %arg1[%6, %c0_7, %c0_8] : memref<8x8x384xf32, #tpu.memory_space<vmem>>, vector<1x8x384xf32>
    %8 = vector.shape_cast %7 : vector<1x8x384xf32> to vector<8x384xf32>
    %9 = vector.extract_strided_slice %8 {offsets = [0, 0], sizes = [8, 256], strides = [1, 1]} : vector<8x384xf32> to vector<8x256xf32>
    %cst = arith.constant dense<0.000000e+00> : vector<8x256xf32>
    %10 = tpu.matmul %5, %3, %cst {dimension_numbers = #tpu.dot_dimension_numbers<[1], [0], [0], [1], [0, 0, 1, 1], [], []>} : vector<8x128xf32>, vector<128x256xf32>, vector<8x256xf32> -> vector<8x256xf32>
    %11 = arith.addf %9, %10 : vector<8x256xf32>
    %12 = arith.negf %11 : vector<8x256xf32>
    %13 = math.exp %12 : vector<8x256xf32>
    %cst_9 = arith.constant 1.000000e+00 : f32
    %14 = vector.broadcast %cst_9 : f32 to vector<8x256xf32>
    %15 = arith.addf %14, %13 : vector<8x256xf32>
    %16 = arith.divf %14, %15 : vector<8x256xf32>
    %17 = vector.extract_strided_slice %16 {offsets = [0, 0], sizes = [8, 128], strides = [1, 1]} : vector<8x256xf32> to vector<8x128xf32>
    %18 = vector.extract_strided_slice %16 {offsets = [0, 128], sizes = [8, 128], strides = [1, 1]} : vector<8x256xf32> to vector<8x128xf32>
    %19 = vector.extract_strided_slice %8 {offsets = [0, 256], sizes = [8, 128], strides = [1, 1]} : vector<8x384xf32> to vector<8x128xf32>
    %20 = arith.mulf %17, %5 : vector<8x128xf32>
    %cst_10 = arith.constant dense<0.000000e+00> : vector<8x128xf32>
    %21 = tpu.matmul %20, %4, %cst_10 {dimension_numbers = #tpu.dot_dimension_numbers<[1], [0], [0], [1], [0, 0, 1, 1], [], []>} : vector<8x128xf32>, vector<128x128xf32>, vector<8x128xf32> -> vector<8x128xf32>
    %22 = arith.addf %19, %21 : vector<8x128xf32>
    %23 = math.tanh %22 : vector<8x128xf32>
    %24 = arith.mulf %18, %5 : vector<8x128xf32>
    %cst_11 = arith.constant 1.000000e+00 : f32
    %25 = vector.broadcast %cst_11 : f32 to vector<8x128xf32>
    %26 = arith.subf %25, %18 : vector<8x128xf32>
    %27 = arith.mulf %26, %23 : vector<8x128xf32>
    %28 = arith.addf %24, %27 : vector<8x128xf32>
    %29 = arith.index_cast %c0_i32_6 : i32 to index
    %c0_12 = arith.constant 0 : index
    %c0_13 = arith.constant 0 : index
    %30 = vector.load %arg5[%29, %c0_12, %c0_13] : memref<8x8x128xf32, #tpu.memory_space<vmem>>, vector<1x8x128xf32>
    %31 = vector.shape_cast %30 : vector<1x8x128xf32> to vector<8x128xf32>
    %32 = vector.shape_cast %28 : vector<8x128xf32> to vector<1x8x128xf32>
    tpu.vector_store %arg5[%29, %c0_12, %c0_13], %32 {strides = array<i32>} : memref<8x8x128xf32, #tpu.memory_space<vmem>>, vector<1x8x128xf32>,
    %c1_i32 = arith.constant 1 : i32
    %33 = arith.index_cast %c1_i32 : i32 to index
    %c0_14 = arith.constant 0 : index
    %c0_15 = arith.constant 0 : index
    %34 = vector.load %arg1[%33, %c0_14, %c0_15] : memref<8x8x384xf32, #tpu.memory_space<vmem>>, vector<1x8x384xf32>
    %35 = vector.shape_cast %34 : vector<1x8x384xf32> to vector<8x384xf32>
    %36 = vector.extract_strided_slice %35 {offsets = [0, 0], sizes = [8, 256], strides = [1, 1]} : vector<8x384xf32> to vector<8x256xf32>
    %cst_16 = arith.constant dense<0.000000e+00> : vector<8x256xf32>
    %37 = tpu.matmul %28, %3, %cst_16 {dimension_numbers = #tpu.dot_dimension_numbers<[1], [0], [0], [1], [0, 0, 1, 1], [], []>} : vector<8x128xf32>, vector<128x256xf32>, vector<8x256xf32> -> vector<8x256xf32>
    %38 = arith.addf %36, %37 : vector<8x256xf32>
    %39 = arith.negf %38 : vector<8x256xf32>
    %40 = math.exp %39 : vector<8x256xf32>
    %cst_17 = arith.constant 1.000000e+00 : f32
    %41 = vector.broadcast %cst_17 : f32 to vector<8x256xf32>
    %42 = arith.addf %41, %40 : vector<8x256xf32>
    %43 = arith.divf %41, %42 : vector<8x256xf32>
    %44 = vector.extract_strided_slice %43 {offsets = [0, 0], sizes = [8, 128], strides = [1, 1]} : vector<8x256xf32> to vector<8x128xf32>
    %45 = vector.extract_strided_slice %43 {offsets = [0, 128], sizes = [8, 128], strides = [1, 1]} : vector<8x256xf32> to vector<8x128xf32>
    %46 = vector.extract_strided_slice %35 {offsets = [0, 256], sizes = [8, 128], strides = [1, 1]} : vector<8x384xf32> to vector<8x128xf32>
    %47 = arith.mulf %44, %28 : vector<8x128xf32>
    %cst_18 = arith.constant dense<0.000000e+00> : vector<8x128xf32>
    %48 = tpu.matmul %47, %4, %cst_18 {dimension_numbers = #tpu.dot_dimension_numbers<[1], [0], [0], [1], [0, 0, 1, 1], [], []>} : vector<8x128xf32>, vector<128x128xf32>, vector<8x128xf32> -> vector<8x128xf32>
    %49 = arith.addf %46, %48 : vector<8x128xf32>
    %50 = math.tanh %49 : vector<8x128xf32>
    %51 = arith.mulf %45, %28 : vector<8x128xf32>
    %cst_19 = arith.constant 1.000000e+00 : f32
    %52 = vector.broadcast %cst_19 : f32 to vector<8x128xf32>
    %53 = arith.subf %52, %45 : vector<8x128xf32>
    %54 = arith.mulf %53, %50 : vector<8x128xf32>
    %55 = arith.addf %51, %54 : vector<8x128xf32>
    %56 = arith.index_cast %c1_i32 : i32 to index
    %c0_20 = arith.constant 0 : index
    %c0_21 = arith.constant 0 : index
    %57 = vector.load %arg5[%56, %c0_20, %c0_21] : memref<8x8x128xf32, #tpu.memory_space<vmem>>, vector<1x8x128xf32>
    %58 = vector.shape_cast %57 : vector<1x8x128xf32> to vector<8x128xf32>
    %59 = vector.shape_cast %55 : vector<8x128xf32> to vector<1x8x128xf32>
    tpu.vector_store %arg5[%56, %c0_20, %c0_21], %59 {strides = array<i32>} : memref<8x8x128xf32, #tpu.memory_space<vmem>>, vector<1x8x128xf32>,
    %c2_i32 = arith.constant 2 : i32
    %60 = arith.index_cast %c2_i32 : i32 to index
    %c0_22 = arith.constant 0 : index
    %c0_23 = arith.constant 0 : index
    %61 = vector.load %arg1[%60, %c0_22, %c0_23] : memref<8x8x384xf32, #tpu.memory_space<vmem>>, vector<1x8x384xf32>
    %62 = vector.shape_cast %61 : vector<1x8x384xf32> to vector<8x384xf32>
    %63 = vector.extract_strided_slice %62 {offsets = [0, 0], sizes = [8, 256], strides = [1, 1]} : vector<8x384xf32> to vector<8x256xf32>
    %cst_24 = arith.constant dense<0.000000e+00> : vector<8x256xf32>
    %64 = tpu.matmul %55, %3, %cst_24 {dimension_numbers = #tpu.dot_dimension_numbers<[1], [0], [0], [1], [0, 0, 1, 1], [], []>} : vector<8x128xf32>, vector<128x256xf32>, vector<8x256xf32> -> vector<8x256xf32>
    %65 = arith.addf %63, %64 : vector<8x256xf32>
    %66 = arith.negf %65 : vector<8x256xf32>
    %67 = math.exp %66 : vector<8x256xf32>
    %cst_25 = arith.constant 1.000000e+00 : f32
    %68 = vector.broadcast %cst_25 : f32 to vector<8x256xf32>
    %69 = arith.addf %68, %67 : vector<8x256xf32>
    %70 = arith.divf %68, %69 : vector<8x256xf32>
    %71 = vector.extract_strided_slice %70 {offsets = [0, 0], sizes = [8, 128], strides = [1, 1]} : vector<8x256xf32> to vector<8x128xf32>
    %72 = vector.extract_strided_slice %70 {offsets = [0, 128], sizes = [8, 128], strides = [1, 1]} : vector<8x256xf32> to vector<8x128xf32>
    %73 = vector.extract_strided_slice %62 {offsets = [0, 256], sizes = [8, 128], strides = [1, 1]} : vector<8x384xf32> to vector<8x128xf32>
    %74 = arith.mulf %71, %55 : vector<8x128xf32>
    %cst_26 = arith.constant dense<0.000000e+00> : vector<8x128xf32>
    %75 = tpu.matmul %74, %4, %cst_26 {dimension_numbers = #tpu.dot_dimension_numbers<[1], [0], [0], [1], [0, 0, 1, 1], [], []>} : vector<8x128xf32>, vector<128x128xf32>, vector<8x128xf32> -> vector<8x128xf32>
    %76 = arith.addf %73, %75 : vector<8x128xf32>
    %77 = math.tanh %76 : vector<8x128xf32>
    %78 = arith.mulf %72, %55 : vector<8x128xf32>
    %cst_27 = arith.constant 1.000000e+00 : f32
    %79 = vector.broadcast %cst_27 : f32 to vector<8x128xf32>
    %80 = arith.subf %79, %72 : vector<8x128xf32>
    %81 = arith.mulf %80, %77 : vector<8x128xf32>
    %82 = arith.addf %78, %81 : vector<8x128xf32>
    %83 = arith.index_cast %c2_i32 : i32 to index
    %c0_28 = arith.constant 0 : index
    %c0_29 = arith.constant 0 : index
    %84 = vector.load %arg5[%83, %c0_28, %c0_29] : memref<8x8x128xf32, #tpu.memory_space<vmem>>, vector<1x8x128xf32>
    %85 = vector.shape_cast %84 : vector<1x8x128xf32> to vector<8x128xf32>
    %86 = vector.shape_cast %82 : vector<8x128xf32> to vector<1x8x128xf32>
    tpu.vector_store %arg5[%83, %c0_28, %c0_29], %86 {strides = array<i32>} : memref<8x8x128xf32, #tpu.memory_space<vmem>>, vector<1x8x128xf32>,
    %c3_i32 = arith.constant 3 : i32
    %87 = arith.index_cast %c3_i32 : i32 to index
    %c0_30 = arith.constant 0 : index
    %c0_31 = arith.constant 0 : index
    %88 = vector.load %arg1[%87, %c0_30, %c0_31] : memref<8x8x384xf32, #tpu.memory_space<vmem>>, vector<1x8x384xf32>
    %89 = vector.shape_cast %88 : vector<1x8x384xf32> to vector<8x384xf32>
    %90 = vector.extract_strided_slice %89 {offsets = [0, 0], sizes = [8, 256], strides = [1, 1]} : vector<8x384xf32> to vector<8x256xf32>
    %cst_32 = arith.constant dense<0.000000e+00> : vector<8x256xf32>
    %91 = tpu.matmul %82, %3, %cst_32 {dimension_numbers = #tpu.dot_dimension_numbers<[1], [0], [0], [1], [0, 0, 1, 1], [], []>} : vector<8x128xf32>, vector<128x256xf32>, vector<8x256xf32> -> vector<8x256xf32>
    %92 = arith.addf %90, %91 : vector<8x256xf32>
    %93 = arith.negf %92 : vector<8x256xf32>
    %94 = math.exp %93 : vector<8x256xf32>
    %cst_33 = arith.constant 1.000000e+00 : f32
    %95 = vector.broadcast %cst_33 : f32 to vector<8x256xf32>
    %96 = arith.addf %95, %94 : vector<8x256xf32>
    %97 = arith.divf %95, %96 : vector<8x256xf32>
    %98 = vector.extract_strided_slice %97 {offsets = [0, 0], sizes = [8, 128], strides = [1, 1]} : vector<8x256xf32> to vector<8x128xf32>
    %99 = vector.extract_strided_slice %97 {offsets = [0, 128], sizes = [8, 128], strides = [1, 1]} : vector<8x256xf32> to vector<8x128xf32>
    %100 = vector.extract_strided_slice %89 {offsets = [0, 256], sizes = [8, 128], strides = [1, 1]} : vector<8x384xf32> to vector<8x128xf32>
    %101 = arith.mulf %98, %82 : vector<8x128xf32>
    %cst_34 = arith.constant dense<0.000000e+00> : vector<8x128xf32>
    %102 = tpu.matmul %101, %4, %cst_34 {dimension_numbers = #tpu.dot_dimension_numbers<[1], [0], [0], [1], [0, 0, 1, 1], [], []>} : vector<8x128xf32>, vector<128x128xf32>, vector<8x128xf32> -> vector<8x128xf32>
    %103 = arith.addf %100, %102 : vector<8x128xf32>
    %104 = math.tanh %103 : vector<8x128xf32>
    %105 = arith.mulf %99, %82 : vector<8x128xf32>
    %cst_35 = arith.constant 1.000000e+00 : f32
    %106 = vector.broadcast %cst_35 : f32 to vector<8x128xf32>
    %107 = arith.subf %106, %99 : vector<8x128xf32>
    %108 = arith.mulf %107, %104 : vector<8x128xf32>
    %109 = arith.addf %105, %108 : vector<8x128xf32>
    %110 = arith.index_cast %c3_i32 : i32 to index
    %c0_36 = arith.constant 0 : index
    %c0_37 = arith.constant 0 : index
    %111 = vector.load %arg5[%110, %c0_36, %c0_37] : memref<8x8x128xf32, #tpu.memory_space<vmem>>, vector<1x8x128xf32>
    %112 = vector.shape_cast %111 : vector<1x8x128xf32> to vector<8x128xf32>
    %113 = vector.shape_cast %109 : vector<8x128xf32> to vector<1x8x128xf32>
    tpu.vector_store %arg5[%110, %c0_36, %c0_37], %113 {strides = array<i32>} : memref<8x8x128xf32, #tpu.memory_space<vmem>>, vector<1x8x128xf32>,
    %c4_i32 = arith.constant 4 : i32
    %114 = arith.index_cast %c4_i32 : i32 to index
    %c0_38 = arith.constant 0 : index
    %c0_39 = arith.constant 0 : index
    %115 = vector.load %arg1[%114, %c0_38, %c0_39] : memref<8x8x384xf32, #tpu.memory_space<vmem>>, vector<1x8x384xf32>
    %116 = vector.shape_cast %115 : vector<1x8x384xf32> to vector<8x384xf32>
    %117 = vector.extract_strided_slice %116 {offsets = [0, 0], sizes = [8, 256], strides = [1, 1]} : vector<8x384xf32> to vector<8x256xf32>
    %cst_40 = arith.constant dense<0.000000e+00> : vector<8x256xf32>
    %118 = tpu.matmul %109, %3, %cst_40 {dimension_numbers = #tpu.dot_dimension_numbers<[1], [0], [0], [1], [0, 0, 1, 1], [], []>} : vector<8x128xf32>, vector<128x256xf32>, vector<8x256xf32> -> vector<8x256xf32>
    %119 = arith.addf %117, %118 : vector<8x256xf32>
    %120 = arith.negf %119 : vector<8x256xf32>
    %121 = math.exp %120 : vector<8x256xf32>
    %cst_41 = arith.constant 1.000000e+00 : f32
    %122 = vector.broadcast %cst_41 : f32 to vector<8x256xf32>
    %123 = arith.addf %122, %121 : vector<8x256xf32>
    %124 = arith.divf %122, %123 : vector<8x256xf32>
    %125 = vector.extract_strided_slice %124 {offsets = [0, 0], sizes = [8, 128], strides = [1, 1]} : vector<8x256xf32> to vector<8x128xf32>
    %126 = vector.extract_strided_slice %124 {offsets = [0, 128], sizes = [8, 128], strides = [1, 1]} : vector<8x256xf32> to vector<8x128xf32>
    %127 = vector.extract_strided_slice %116 {offsets = [0, 256], sizes = [8, 128], strides = [1, 1]} : vector<8x384xf32> to vector<8x128xf32>
    %128 = arith.mulf %125, %109 : vector<8x128xf32>
    %cst_42 = arith.constant dense<0.000000e+00> : vector<8x128xf32>
    %129 = tpu.matmul %128, %4, %cst_42 {dimension_numbers = #tpu.dot_dimension_numbers<[1], [0], [0], [1], [0, 0, 1, 1], [], []>} : vector<8x128xf32>, vector<128x128xf32>, vector<8x128xf32> -> vector<8x128xf32>
    %130 = arith.addf %127, %129 : vector<8x128xf32>
    %131 = math.tanh %130 : vector<8x128xf32>
    %132 = arith.mulf %126, %109 : vector<8x128xf32>
    %cst_43 = arith.constant 1.000000e+00 : f32
    %133 = vector.broadcast %cst_43 : f32 to vector<8x128xf32>
    %134 = arith.subf %133, %126 : vector<8x128xf32>
    %135 = arith.mulf %134, %131 : vector<8x128xf32>
    %136 = arith.addf %132, %135 : vector<8x128xf32>
    %137 = arith.index_cast %c4_i32 : i32 to index
    %c0_44 = arith.constant 0 : index
    %c0_45 = arith.constant 0 : index
    %138 = vector.load %arg5[%137, %c0_44, %c0_45] : memref<8x8x128xf32, #tpu.memory_space<vmem>>, vector<1x8x128xf32>
    %139 = vector.shape_cast %138 : vector<1x8x128xf32> to vector<8x128xf32>
    %140 = vector.shape_cast %136 : vector<8x128xf32> to vector<1x8x128xf32>
    tpu.vector_store %arg5[%137, %c0_44, %c0_45], %140 {strides = array<i32>} : memref<8x8x128xf32, #tpu.memory_space<vmem>>, vector<1x8x128xf32>,
    %c5_i32 = arith.constant 5 : i32
    %141 = arith.index_cast %c5_i32 : i32 to index
    %c0_46 = arith.constant 0 : index
    %c0_47 = arith.constant 0 : index
    %142 = vector.load %arg1[%141, %c0_46, %c0_47] : memref<8x8x384xf32, #tpu.memory_space<vmem>>, vector<1x8x384xf32>
    %143 = vector.shape_cast %142 : vector<1x8x384xf32> to vector<8x384xf32>
    %144 = vector.extract_strided_slice %143 {offsets = [0, 0], sizes = [8, 256], strides = [1, 1]} : vector<8x384xf32> to vector<8x256xf32>
    %cst_48 = arith.constant dense<0.000000e+00> : vector<8x256xf32>
    %145 = tpu.matmul %136, %3, %cst_48 {dimension_numbers = #tpu.dot_dimension_numbers<[1], [0], [0], [1], [0, 0, 1, 1], [], []>} : vector<8x128xf32>, vector<128x256xf32>, vector<8x256xf32> -> vector<8x256xf32>
    %146 = arith.addf %144, %145 : vector<8x256xf32>
    %147 = arith.negf %146 : vector<8x256xf32>
    %148 = math.exp %147 : vector<8x256xf32>
    %cst_49 = arith.constant 1.000000e+00 : f32
    %149 = vector.broadcast %cst_49 : f32 to vector<8x256xf32>
    %150 = arith.addf %149, %148 : vector<8x256xf32>
    %151 = arith.divf %149, %150 : vector<8x256xf32>
    %152 = vector.extract_strided_slice %151 {offsets = [0, 0], sizes = [8, 128], strides = [1, 1]} : vector<8x256xf32> to vector<8x128xf32>
    %153 = vector.extract_strided_slice %151 {offsets = [0, 128], sizes = [8, 128], strides = [1, 1]} : vector<8x256xf32> to vector<8x128xf32>
    %154 = vector.extract_strided_slice %143 {offsets = [0, 256], sizes = [8, 128], strides = [1, 1]} : vector<8x384xf32> to vector<8x128xf32>
    %155 = arith.mulf %152, %136 : vector<8x128xf32>
    %cst_50 = arith.constant dense<0.000000e+00> : vector<8x128xf32>
    %156 = tpu.matmul %155, %4, %cst_50 {dimension_numbers = #tpu.dot_dimension_numbers<[1], [0], [0], [1], [0, 0, 1, 1], [], []>} : vector<8x128xf32>, vector<128x128xf32>, vector<8x128xf32> -> vector<8x128xf32>
    %157 = arith.addf %154, %156 : vector<8x128xf32>
    %158 = math.tanh %157 : vector<8x128xf32>
    %159 = arith.mulf %153, %136 : vector<8x128xf32>
    %cst_51 = arith.constant 1.000000e+00 : f32
    %160 = vector.broadcast %cst_51 : f32 to vector<8x128xf32>
    %161 = arith.subf %160, %153 : vector<8x128xf32>
    %162 = arith.mulf %161, %158 : vector<8x128xf32>
    %163 = arith.addf %159, %162 : vector<8x128xf32>
    %164 = arith.index_cast %c5_i32 : i32 to index
    %c0_52 = arith.constant 0 : index
    %c0_53 = arith.constant 0 : index
    %165 = vector.load %arg5[%164, %c0_52, %c0_53] : memref<8x8x128xf32, #tpu.memory_space<vmem>>, vector<1x8x128xf32>
    %166 = vector.shape_cast %165 : vector<1x8x128xf32> to vector<8x128xf32>
    %167 = vector.shape_cast %163 : vector<8x128xf32> to vector<1x8x128xf32>
    tpu.vector_store %arg5[%164, %c0_52, %c0_53], %167 {strides = array<i32>} : memref<8x8x128xf32, #tpu.memory_space<vmem>>, vector<1x8x128xf32>,
    %c6_i32 = arith.constant 6 : i32
    %168 = arith.index_cast %c6_i32 : i32 to index
    %c0_54 = arith.constant 0 : index
    %c0_55 = arith.constant 0 : index
    %169 = vector.load %arg1[%168, %c0_54, %c0_55] : memref<8x8x384xf32, #tpu.memory_space<vmem>>, vector<1x8x384xf32>
    %170 = vector.shape_cast %169 : vector<1x8x384xf32> to vector<8x384xf32>
    %171 = vector.extract_strided_slice %170 {offsets = [0, 0], sizes = [8, 256], strides = [1, 1]} : vector<8x384xf32> to vector<8x256xf32>
    %cst_56 = arith.constant dense<0.000000e+00> : vector<8x256xf32>
    %172 = tpu.matmul %163, %3, %cst_56 {dimension_numbers = #tpu.dot_dimension_numbers<[1], [0], [0], [1], [0, 0, 1, 1], [], []>} : vector<8x128xf32>, vector<128x256xf32>, vector<8x256xf32> -> vector<8x256xf32>
    %173 = arith.addf %171, %172 : vector<8x256xf32>
    %174 = arith.negf %173 : vector<8x256xf32>
    %175 = math.exp %174 : vector<8x256xf32>
    %cst_57 = arith.constant 1.000000e+00 : f32
    %176 = vector.broadcast %cst_57 : f32 to vector<8x256xf32>
    %177 = arith.addf %176, %175 : vector<8x256xf32>
    %178 = arith.divf %176, %177 : vector<8x256xf32>
    %179 = vector.extract_strided_slice %178 {offsets = [0, 0], sizes = [8, 128], strides = [1, 1]} : vector<8x256xf32> to vector<8x128xf32>
    %180 = vector.extract_strided_slice %178 {offsets = [0, 128], sizes = [8, 128], strides = [1, 1]} : vector<8x256xf32> to vector<8x128xf32>
    %181 = vector.extract_strided_slice %170 {offsets = [0, 256], sizes = [8, 128], strides = [1, 1]} : vector<8x384xf32> to vector<8x128xf32>
    %182 = arith.mulf %179, %163 : vector<8x128xf32>
    %cst_58 = arith.constant dense<0.000000e+00> : vector<8x128xf32>
    %183 = tpu.matmul %182, %4, %cst_58 {dimension_numbers = #tpu.dot_dimension_numbers<[1], [0], [0], [1], [0, 0, 1, 1], [], []>} : vector<8x128xf32>, vector<128x128xf32>, vector<8x128xf32> -> vector<8x128xf32>
    %184 = arith.addf %181, %183 : vector<8x128xf32>
    %185 = math.tanh %184 : vector<8x128xf32>
    %186 = arith.mulf %180, %163 : vector<8x128xf32>
    %cst_59 = arith.constant 1.000000e+00 : f32
    %187 = vector.broadcast %cst_59 : f32 to vector<8x128xf32>
    %188 = arith.subf %187, %180 : vector<8x128xf32>
    %189 = arith.mulf %188, %185 : vector<8x128xf32>
    %190 = arith.addf %186, %189 : vector<8x128xf32>
    %191 = arith.index_cast %c6_i32 : i32 to index
    %c0_60 = arith.constant 0 : index
    %c0_61 = arith.constant 0 : index
    %192 = vector.load %arg5[%191, %c0_60, %c0_61] : memref<8x8x128xf32, #tpu.memory_space<vmem>>, vector<1x8x128xf32>
    %193 = vector.shape_cast %192 : vector<1x8x128xf32> to vector<8x128xf32>
    %194 = vector.shape_cast %190 : vector<8x128xf32> to vector<1x8x128xf32>
    tpu.vector_store %arg5[%191, %c0_60, %c0_61], %194 {strides = array<i32>} : memref<8x8x128xf32, #tpu.memory_space<vmem>>, vector<1x8x128xf32>,
    %c7_i32 = arith.constant 7 : i32
    %195 = arith.index_cast %c7_i32 : i32 to index
    %c0_62 = arith.constant 0 : index
    %c0_63 = arith.constant 0 : index
    %196 = vector.load %arg1[%195, %c0_62, %c0_63] : memref<8x8x384xf32, #tpu.memory_space<vmem>>, vector<1x8x384xf32>
    %197 = vector.shape_cast %196 : vector<1x8x384xf32> to vector<8x384xf32>
    %198 = vector.extract_strided_slice %197 {offsets = [0, 0], sizes = [8, 256], strides = [1, 1]} : vector<8x384xf32> to vector<8x256xf32>
    %cst_64 = arith.constant dense<0.000000e+00> : vector<8x256xf32>
    %199 = tpu.matmul %190, %3, %cst_64 {dimension_numbers = #tpu.dot_dimension_numbers<[1], [0], [0], [1], [0, 0, 1, 1], [], []>} : vector<8x128xf32>, vector<128x256xf32>, vector<8x256xf32> -> vector<8x256xf32>
    %200 = arith.addf %198, %199 : vector<8x256xf32>
    %201 = arith.negf %200 : vector<8x256xf32>
    %202 = math.exp %201 : vector<8x256xf32>
    %cst_65 = arith.constant 1.000000e+00 : f32
    %203 = vector.broadcast %cst_65 : f32 to vector<8x256xf32>
    %204 = arith.addf %203, %202 : vector<8x256xf32>
    %205 = arith.divf %203, %204 : vector<8x256xf32>
    %206 = vector.extract_strided_slice %205 {offsets = [0, 0], sizes = [8, 128], strides = [1, 1]} : vector<8x256xf32> to vector<8x128xf32>
    %207 = vector.extract_strided_slice %205 {offsets = [0, 128], sizes = [8, 128], strides = [1, 1]} : vector<8x256xf32> to vector<8x128xf32>
    %208 = vector.extract_strided_slice %197 {offsets = [0, 256], sizes = [8, 128], strides = [1, 1]} : vector<8x384xf32> to vector<8x128xf32>
    %209 = arith.mulf %206, %190 : vector<8x128xf32>
    %cst_66 = arith.constant dense<0.000000e+00> : vector<8x128xf32>
    %210 = tpu.matmul %209, %4, %cst_66 {dimension_numbers = #tpu.dot_dimension_numbers<[1], [0], [0], [1], [0, 0, 1, 1], [], []>} : vector<8x128xf32>, vector<128x128xf32>, vector<8x128xf32> -> vector<8x128xf32>
    %211 = arith.addf %208, %210 : vector<8x128xf32>
    %212 = math.tanh %211 : vector<8x128xf32>
    %213 = arith.mulf %207, %190 : vector<8x128xf32>
    %cst_67 = arith.constant 1.000000e+00 : f32
    %214 = vector.broadcast %cst_67 : f32 to vector<8x128xf32>
    %215 = arith.subf %214, %207 : vector<8x128xf32>
    %216 = arith.mulf %215, %212 : vector<8x128xf32>
    %217 = arith.addf %213, %216 : vector<8x128xf32>
    %218 = arith.index_cast %c7_i32 : i32 to index
    %c0_68 = arith.constant 0 : index
    %c0_69 = arith.constant 0 : index
    %219 = vector.load %arg5[%218, %c0_68, %c0_69] : memref<8x8x128xf32, #tpu.memory_space<vmem>>, vector<1x8x128xf32>
    %220 = vector.shape_cast %219 : vector<1x8x128xf32> to vector<8x128xf32>
    %221 = vector.shape_cast %217 : vector<8x128xf32> to vector<1x8x128xf32>
    tpu.vector_store %arg5[%218, %c0_68, %c0_69], %221 {strides = array<i32>} : memref<8x8x128xf32, #tpu.memory_space<vmem>>, vector<1x8x128xf32>,
    %c8_i32 = arith.constant 8 : i32
    %c0_70 = arith.constant 0 : index
    %c0_71 = arith.constant 0 : index
    %222 = vector.load %arg6[%c0_70, %c0_71] : memref<8x128xf32, #tpu.memory_space<vmem>>, vector<8x128xf32>
    tpu.vector_store %arg6[%c0_70, %c0_71], %217 {strides = array<i32>} : memref<8x128xf32, #tpu.memory_space<vmem>>, vector<8x128xf32>,
    return
  }
  func.func @transform_0(%arg0: i32) -> (i32, i32, i32) {
    %c0_i32 = arith.constant 0 : i32
    %c0_i32_0 = arith.constant 0 : i32
    %c0_i32_1 = arith.constant 0 : i32
    return %arg0, %c0_i32, %c0_i32_0 : i32, i32, i32
  }
  func.func @transform_1(%arg0: i32) -> (i32, i32) {
    %c0_i32 = arith.constant 0 : i32
    %c0_i32_0 = arith.constant 0 : i32
    %c0_i32_1 = arith.constant 0 : i32
    return %c0_i32, %c0_i32_0 : i32, i32
  }
  func.func @transform_2(%arg0: i32) -> (i32, i32) {
    %c0_i32 = arith.constant 0 : i32
    %c0_i32_0 = arith.constant 0 : i32
    %c0_i32_1 = arith.constant 0 : i32
    return %c0_i32, %c0_i32_0 : i32, i32
  }
  func.func @transform_3(%arg0: i32) -> (i32, i32) {
    %c0_i32 = arith.constant 0 : i32
    %c0_i32_0 = arith.constant 0 : i32
    %c0_i32_1 = arith.constant 0 : i32
    return %c0_i32, %c0_i32_0 : i32, i32
  }
  func.func @transform_4(%arg0: i32) -> (i32, i32, i32) {
    %c0_i32 = arith.constant 0 : i32
    %c0_i32_0 = arith.constant 0 : i32
    %c0_i32_1 = arith.constant 0 : i32
    return %arg0, %c0_i32, %c0_i32_0 : i32, i32, i32
  }
}

</mosaic_0001>

<bundles_post_ra>
// kernel: gru_forward.2
= control target key start
LH: loop header
LB: loop body
LE: loop exit
PB: predicated region body
PF: predicated region fallthrough
CT: control target
= control target key end

     0   :  { %v2410_v3 = vmov 0.0   ;;  %v2411_v4 = vmov 0.0|0.0   ;;  %vm2412_vm0 = vmmov 0   ;;  %s3044_s1 = inlined_call_operand.vmem [shape: f32[128,256], index: 1, kind: input, shape index: {}]   ;;  %s3045_s3 = inlined_call_operand.vmem [shape: f32[8,128], index: 3, kind: input, shape index: {}]   ;;  %s3046_s2 = inlined_call_operand.vmem [shape: f32[128,128], index: 2, kind: input, shape index: {}]   ;;  %s3047_s0 = inlined_call_operand.vmem [shape: f32[8,8,384], index: 0, kind: input, shape index: {}]   ;;  %s3048_s4 = inlined_call_operand.vmem [shape: f32[8,8,128], index: 4, kind: output, shape index: {}]  }
   0x1   :  { %v24_v0 = vld [vmem:[%s3044_s1 + $0x8] sm:$0xff]  ;;  %v26_v1 = vld [vmem:[%s3044_s1 + $0x18] sm:$0xff]  ;;  %v23_v2 = vld [vmem:[%s3044_s1] sm:$0xff]  ;;  %139 = vmatprep.mubr.f32.mxu0 %v2410_v3  ;;  %1911 = vmatprep.subr.bf16.mxu1 %v2411_v4 }
   0x2   :  { %v2449_v5 = vpack.c.bf16 %v26_v1, %v24_v0  ;;  %v25_v6 = vld [vmem:[%s3044_s1 + $0x10] sm:$0xff]  ;;  %v28_v7 = vld [vmem:[%s3044_s1 + $0x28] sm:$0xff]  ;;  %v30_v8 = vld [vmem:[%s3044_s1 + $0x38] sm:$0xff]  ;;  %1631 = vmatprep.mubr.msk.f32.mxu1 %vm2412_vm0, %v2410_v3 }
   0x3   :  { %v2460_v9 = vpack.c.bf16 %v25_v6, %v23_v2  ;;  %v2462_v10 = vpack.c.bf16 %v30_v8, %v28_v7  ;;  %v27_v11 = vld [vmem:[%s3044_s1 + $0x20] sm:$0xff]  ;;  %v29_v12 = vld [vmem:[%s3044_s1 + $0x30] sm:$0xff]  ;;  %v32_v13 = vld [vmem:[%s3044_s1 + $0x48] sm:$0xff] }
   0x4   :  { %1880 = vmatprep.subr.bf16.mxu0 %v2449_v5  ;;  %v34_v14 = vld [vmem:[%s3044_s1 + $0x58] sm:$0xff]  ;;  %v2478_v15 = vpack.c.bf16 %v29_v12, %v27_v11  ;;  %v31_v17 = vld [vmem:[%s3044_s1 + $0x40] sm:$0xff]  ;;  %v33_v18 = vld [vmem:[%s3044_s1 + $0x50] sm:$0xff] }
   0x5   :  { %1882 = vmatpush1.bf16.msra.mxu0 %v2460_v9  ;;  %v2481_v16 = vpack.c.bf16 %v34_v14, %v32_v13  ;;  %v36_v19 = vld [vmem:[%s3044_s1 + $0x68] sm:$0xff]  ;;  %v38_v20 = vld [vmem:[%s3044_s1 + $0x78] sm:$0xff]  ;;  %v2496_v21 = vpack.c.bf16 %v33_v18, %v31_v17  ;;  %v35_v23 = vld [vmem:[%s3044_s1 + $0x60] sm:$0xff] }
   0x6   :  { %1884 = vmatprep.subr.bf16.mxu0 %v2462_v10  ;;  %v2499_v22 = vpack.c.bf16 %v38_v20, %v36_v19  ;;  %v37_v24 = vld [vmem:[%s3044_s1 + $0x70] sm:$0xff]  ;;  %v40_v25 = vld [vmem:[%s3044_s1 + $0x88] sm:$0xff]  ;;  %v42_v26 = vld [vmem:[%s3044_s1 + $0x98] sm:$0xff] }
   0x7   :  { %v2514_v27 = vpack.c.bf16 %v37_v24, %v35_v23  ;;  %v2517_v28 = vpack.c.bf16 %v42_v26, %v40_v25  ;;  %v39_v29 = vld [vmem:[%s3044_s1 + $0x80] sm:$0xff]  ;;  %v41_v30 = vld [vmem:[%s3044_s1 + $0x90] sm:$0xff]  ;;  %v44_v31 = vld [vmem:[%s3044_s1 + $0xa8] sm:$0xff] }
   0x8   :  { %v46_v32 = vld [vmem:[%s3044_s1 + $0xb8] sm:$0xff]  ;;  %v2532_v33 = vpack.c.bf16 %v41_v30, %v39_v29  ;;  %v43_v35 = vld [vmem:[%s3044_s1 + $0xa0] sm:$0xff]  ;;  %v45_v36 = vld [vmem:[%s3044_s1 + $0xb0] sm:$0xff] }
   0x9   :  { %1886 = vmatpush1.bf16.msra.mxu0 %v2478_v15  ;;  %v2535_v34 = vpack.c.bf16 %v46_v32, %v44_v31  ;;  %v48_v37 = vld [vmem:[%s3044_s1 + $0xc8] sm:$0xff]  ;;  %v50_v38 = vld [vmem:[%s3044_s1 + $0xd8] sm:$0xff]  ;;  %v2550_v39 = vpack.c.bf16 %v45_v36, %v43_v35  ;;  %v47_v41 = vld [vmem:[%s3044_s1 + $0xc0] sm:$0xff] }
   0xa   :  { %1888 = vmatprep.subr.bf16.mxu0 %v2481_v16  ;;  %v2553_v40 = vpack.c.bf16 %v50_v38, %v48_v37  ;;  %v49_v42 = vld [vmem:[%s3044_s1 + $0xd0] sm:$0xff]  ;;  %v52_v43 = vld [vmem:[%s3044_s1 + $0xe8] sm:$0xff]  ;;  %v54_v44 = vld [vmem:[%s3044_s1 + $0xf8] sm:$0xff] }
   0xb   :  { %v2568_v45 = vpack.c.bf16 %v49_v42, %v47_v41  ;;  %v2571_v46 = vpack.c.bf16 %v54_v44, %v52_v43  ;;  %v51_v47 = vld [vmem:[%s3044_s1 + $0xe0] sm:$0xff]  ;;  %v53_v48 = vld [vmem:[%s3044_s1 + $0xf0] sm:$0xff]  ;;  %v56_v52 = vld [vmem:[%s3046_s2 + $0x8] sm:$0xff] }
   0xc   :  { %v2580_v49 = vpack.c.bf16 %v53_v48, %v51_v47  ;;  %v2587_v50 = vld [vmem:[%s3045_s3] sm:$0xff]  ;;  %v57_v54 = vld [vmem:[%s3046_s2 + $0x10] sm:$0xff]  ;;  %v58_v55 = vld [vmem:[%s3046_s2 + $0x18] sm:$0xff] }
   0xd   :  { %1890 = vmatpush1.bf16.msra.mxu0 %v2496_v21  ;;  %v55_v51 = vld [vmem:[%s3046_s2] sm:$0xff]  ;;  %v2624_v56 = vpack.c.bf16 %v58_v55, %v57_v54  ;;  %v60_v58 = vld [vmem:[%s3046_s2 + $0x28] sm:$0xff]  ;;  %v61_v60 = vld [vmem:[%s3046_s2 + $0x30] sm:$0xff] }
   0xe   :  { %1892 = vmatprep.subr.bf16.mxu0 %v2499_v22  ;;  %v2614_v53 = vpack.c.bf16 %v56_v52, %v55_v51  ;;  %v59_v57 = vld [vmem:[%s3046_s2 + $0x20] sm:$0xff]  ;;  %v62_v61 = vld [vmem:[%s3046_s2 + $0x38] sm:$0xff]  ;;  %v64_v0 = vld [vmem:[%s3046_s2 + $0x48] sm:$0xff] }
   0xf   :  { %v2634_v59 = vpack.c.bf16 %v60_v58, %v59_v57  ;;  %v2644_v62 = vpack.c.bf16 %v62_v61, %v61_v60  ;;  %v63_v63 = vld [vmem:[%s3046_s2 + $0x40] sm:$0xff]  ;;  %v65_v2 = vld [vmem:[%s3046_s2 + $0x50] sm:$0xff]  ;;  %v66_v6 = vld [vmem:[%s3046_s2 + $0x58] sm:$0xff] }
  0x10   :  { %1913 = vmatpush3.bf16.msra.mxu1 %v2614_v53  ;;  %v2654_v1 = vpack.c.bf16 %v64_v0, %v63_v63  ;;  %v2664_v7 = vpack.c.bf16 %v66_v6, %v65_v2  ;;  %v67_v8 = vld [vmem:[%s3046_s2 + $0x60] sm:$0xff]  ;;  %v68_v11 = vld [vmem:[%s3046_s2 + $0x68] sm:$0xff]  ;;  %v69_v13 = vld [vmem:[%s3046_s2 + $0x70] sm:$0xff] }
  0x11   :  { %1894 = vmatpush1.bf16.msra.mxu0 %v2514_v27  ;;  %1914 = vmatprep.subr.bf16.mxu1 %v2411_v4  ;;  %v2673_v12 = vpack.c.bf16 %v68_v11, %v67_v8  ;;  %v70_v14 = vld [vmem:[%s3046_s2 + $0x78] sm:$0xff]  ;;  %v72_v18 = vld [vmem:[%s3047_s0] sm:$0xff]  ;;  %v73_v31 = vld [vmem:[%s3047_s0 + $0x8] sm:$0xff] }
  0x12   :  { %1896 = vmatprep.subr.bf16.mxu0 %v2517_v28  ;;  %v2685_v17 = vpack.c.bf16 %v70_v14, %v69_v13  ;;  %v74_v38 = vld [vmem:[%s3047_s0 + $0x10] sm:$0xff]  ;;  %v1422_v6 = vld [vmem:[%s3047_s0 + $0x20] sm:$0xff] }
  0x14   :  { %1916 = vmatpush3.bf16.msra.mxu1 %v2624_v56 }
  0x15   :  { %1898 = vmatpush1.bf16.msra.mxu0 %v2532_v33  ;;  %1917 = vmatprep.subr.bf16.mxu1 %v2411_v4 }
  0x16   :  { %1900 = vmatprep.subr.bf16.mxu0 %v2535_v34 }
  0x18   :  { %1919 = vmatpush3.bf16.msra.mxu1 %v2634_v59 }
  0x19   :  { %1902 = vmatpush1.bf16.msra.mxu0 %v2550_v39  ;;  %1920 = vmatprep.subr.bf16.mxu1 %v2411_v4 }
  0x1a   :  { %1904 = vmatprep.subr.bf16.mxu0 %v2553_v40 }
  0x1c   :  { %1922 = vmatpush3.bf16.msra.mxu1 %v2644_v62 }
  0x1d   :  { %1906 = vmatpush1.bf16.msra.mxu0 %v2568_v45  ;;  %1923 = vmatprep.subr.bf16.mxu1 %v2411_v4 }
  0x1e   :  { %1908 = vmatprep.subr.bf16.mxu0 %v2571_v46 }
  0x20   :  { %1925 = vmatpush3.bf16.msra.mxu1 %v2654_v1 }
  0x21   :  { %1910 = vmatpush1.bf16.msra.mxu0 %v2580_v49  ;;  %1926 = vmatprep.subr.bf16.mxu1 %v2411_v4 }
  0x22   :  { %1936 = vmatprep.subr.bf16.mxu0 %v2449_v5 }
  0x24   :  { %140 = vmatmul.mubr.f32.vlgmr.msra.gmra.mrb[0].mxu0 %v2587_v50  ;;  %1928 = vmatpush3.bf16.msra.mxu1 %v2664_v7 }
  0x25   :  { %1938 = vmatpush1.bf16.msra.mxu0 %v2460_v9  ;;  %306 = vmatprep.mubr.f32.mxu0 %v2410_v3 }
  0x26   :  { %1940 = vmatprep.subr.bf16.mxu0 %v2462_v10  ;;  %1929 = vmatprep.subr.bf16.mxu1 %v2411_v4 }
  0x28   :  { %1931 = vmatpush3.bf16.msra.mxu1 %v2673_v12 }
  0x29   :  { %1942 = vmatpush1.bf16.msra.mxu0 %v2478_v15  ;;  %1932 = vmatprep.subr.bf16.mxu1 %v2411_v4 }
  0x2a   :  { %1944 = vmatprep.subr.bf16.mxu0 %v2481_v16 }
  0x2c   :  { %1934 = vmatpush3.bf16.msra.mxu1 %v2685_v17 }
  0x2d   :  { %1946 = vmatpush1.bf16.msra.mxu0 %v2496_v21  ;;  %1967 = vmatprep.subr.bf16.mxu1 %v2411_v4 }
  0x2e   :  { %1948 = vmatprep.subr.bf16.mxu0 %v2499_v22 }
  0x31   :  { %1950 = vmatpush1.bf16.msra.mxu0 %v2514_v27 }
  0x32   :  { %1952 = vmatprep.subr.bf16.mxu0 %v2517_v28 }
  0x35   :  { %1954 = vmatpush1.bf16.msra.mxu0 %v2532_v33 }
  0x36   :  { %1956 = vmatprep.subr.bf16.mxu0 %v2535_v34 }
  0x39   :  { %1958 = vmatpush1.bf16.msra.mxu0 %v2550_v39 }
  0x3a   :  { %1960 = vmatprep.subr.bf16.mxu0 %v2553_v40 }
  0x3d   :  { %1962 = vmatpush1.bf16.msra.mxu0 %v2568_v45 }
  0x3e   :  { %1964 = vmatprep.subr.bf16.mxu0 %v2571_v46 }
  0x41   :  { %1966 = vmatpush1.bf16.msra.mxu0 %v2580_v49 }
  0x42   :  { %1992 = vmatprep.subr.bf16.mxu0 %v2449_v5 }
  0xf7   :  { %v141_v19 = vpop.f32.mrb[0].mxu0 }
  0xf8   :  { %v146_v20 = vadd.f32 %v141_v19, %v72_v18  ;;  %v143_v23 = vpop.f32.mrb[1].mxu0  ;;  %v1423_v18 = vld [vmem:[%s3047_s0 + $0x28] sm:$0xff] }
  0xf9   :  { %v147_v32 = vadd.f32 %v143_v23, %v73_v31 }
  0xfa   :  { %v1419_v24 = vmul.f32 -1.442695, %v146_v20 }
  0xfb   :  { %v1420_v35 = vmul.f32 -1.442695, %v147_v32  ;;  %v1427_v32 = vld [vmem:[%s3047_s0 + $0x30] sm:$0xff] }
  0xfc   :  { %2330 = vpow2.f32 %v1419_v24 }
 0x106   :  { %v2331_v25 = vpop.eup %2330 }
 0x107   :  { %v154_v26 = vadd.f32 1.0, %v2331_v25 }
 0x109   :  { %2332 = vrcp.f32 %v154_v26 }
 0x10a   :  { %2334 = vpow2.f32 %v1420_v35 }
 0x113   :  { %v2333_v29 = vpop.eup %2332 }
 0x114   :  { %v160_v30 = vmul.f32 %v2333_v29, %v2587_v50  ;;  %v2335_v36 = vpop.eup %2334 }
 0x115   :  { %v155_v37 = vadd.f32 1.0, %v2335_v36 }
 0x116   :  { %1632 = vmatmul.mubr.f32.vlgmr.msra.gmra.mrb[0].mxu1 %v160_v30 }
 0x117   :  { %1969 = vmatpush3.bf16.msra.mxu1 %v2614_v53  ;;  %1666 = vmatprep.mubr.msk.f32.mxu1 %vm2412_vm0, %v2410_v3  ;;  %2336 = vrcp.f32 %v155_v37 }
 0x118   :  { %1970 = vmatprep.subr.bf16.mxu1 %v2411_v4 }
 0x11b   :  { %1972 = vmatpush3.bf16.msra.mxu1 %v2624_v56 }
 0x11c   :  { %1973 = vmatprep.subr.bf16.mxu1 %v2411_v4 }
 0x11f   :  { %1975 = vmatpush3.bf16.msra.mxu1 %v2634_v59 }
 0x120   :  { %1976 = vmatprep.subr.bf16.mxu1 %v2411_v4 }
 0x121   :  { %v2337_v44 = vpop.eup %2336 }
 0x122   :  { %v234_v47 = vsub.f32 1.0, %v2337_v44  ;;  %v233_v51 = vmul.f32 %v2337_v44, %v2587_v50  ;;  %v1421_v50 = vld [vmem:[%s3047_s0 + $0x18] sm:$0xff] }
 0x123   :  { %1978 = vmatpush3.bf16.msra.mxu1 %v2644_v62 }
 0x124   :  { %1979 = vmatprep.subr.bf16.mxu1 %v2411_v4 }
 0x127   :  { %1981 = vmatpush3.bf16.msra.mxu1 %v2654_v1 }
 0x128   :  { %1982 = vmatprep.subr.bf16.mxu1 %v2411_v4 }
 0x12b   :  { %1984 = vmatpush3.bf16.msra.mxu1 %v2664_v7 }
 0x12c   :  { %1985 = vmatprep.subr.bf16.mxu1 %v2411_v4 }
 0x12f   :  { %1987 = vmatpush3.bf16.msra.mxu1 %v2673_v12 }
 0x130   :  { %1988 = vmatprep.subr.bf16.mxu1 %v2411_v4 }
 0x133   :  { %1990 = vmatpush3.bf16.msra.mxu1 %v2685_v17 }
 0x134   :  { %2023 = vmatprep.subr.bf16.mxu1 %v2411_v4 }
 0x1e9   :  { %v227_v41 = vpop.f32.mrb[0].mxu1 }
 0x1ea   :  { %v231_v42 = vadd.f32 %v227_v41, %v74_v38  ;;  %v1633_v43 = vpop.f32.mrb[1].mxu1 }
 0x1ec   :  { %2338 = vtanh.f32 %v231_v42 }
 0x1f6   :  { %v2339_v48 = vpop.eup %2338 }
 0x1f7   :  { %v235_v52 = vmul.f32 %v2339_v48, %v234_v47  ;;  %v1428_v47 = vld [vmem:[%s3047_s0 + $0x38] sm:$0xff] }
 0x1f9   :  { %v2719_v54 = vadd.f32 %v235_v52, %v233_v51 }
 0x1fb   :  { %237 = vst [vmem:[%s3048_s4] sm:$0xff] %v2719_v54  ;;  %307 = vmatmul.mubr.f32.vlgmr.msra.gmra.mrb[2].mxu0 %v2719_v54 }
 0x1fc   :  { %1994 = vmatpush1.bf16.msra.mxu0 %v2460_v9  ;;  %474 = vmatprep.mubr.f32.mxu0 %v2410_v3 }
 0x1fd   :  { %1996 = vmatprep.subr.bf16.mxu0 %v2462_v10 }
 0x200   :  { %1998 = vmatpush1.bf16.msra.mxu0 %v2478_v15 }
 0x201   :  { %2000 = vmatprep.subr.bf16.mxu0 %v2481_v16 }
 0x204   :  { %2002 = vmatpush1.bf16.msra.mxu0 %v2496_v21 }
 0x205   :  { %2004 = vmatprep.subr.bf16.mxu0 %v2499_v22 }
 0x208   :  { %2006 = vmatpush1.bf16.msra.mxu0 %v2514_v27 }
 0x209   :  { %2008 = vmatprep.subr.bf16.mxu0 %v2517_v28 }
 0x20c   :  { %2010 = vmatpush1.bf16.msra.mxu0 %v2532_v33 }
 0x20d   :  { %2012 = vmatprep.subr.bf16.mxu0 %v2535_v34 }
 0x210   :  { %2014 = vmatpush1.bf16.msra.mxu0 %v2550_v39 }
 0x211   :  { %2016 = vmatprep.subr.bf16.mxu0 %v2553_v40 }
 0x214   :  { %2018 = vmatpush1.bf16.msra.mxu0 %v2568_v45 }
 0x215   :  { %2020 = vmatprep.subr.bf16.mxu0 %v2571_v46 }
 0x218   :  { %2022 = vmatpush1.bf16.msra.mxu0 %v2580_v49 }
 0x219   :  { %2048 = vmatprep.subr.bf16.mxu0 %v2449_v5 }
 0x2ce   :  { %v308_v55 = vpop.f32.mrb[2].mxu0 }
 0x2cf   :  { %v313_v57 = vadd.f32 %v1421_v50, %v308_v55  ;;  %v310_v58 = vpop.f32.mrb[3].mxu0  ;;  %v1429_v50 = vld [vmem:[%s3047_s0 + $0x40] sm:$0xff] }
 0x2d0   :  { %v314_v8 = vadd.f32 %v1422_v6, %v310_v58 }
 0x2d1   :  { %v1424_v60 = vmul.f32 -1.442695, %v313_v57 }
 0x2d2   :  { %v1425_v11 = vmul.f32 -1.442695, %v314_v8  ;;  %v1433_v8 = vld [vmem:[%s3047_s0 + $0x48] sm:$0xff] }
 0x2d3   :  { %2340 = vpow2.f32 %v1424_v60 }
 0x2dd   :  { %v2341_v61 = vpop.eup %2340 }
 0x2de   :  { %v321_v63 = vadd.f32 1.0, %v2341_v61 }
 0x2e0   :  { %2342 = vrcp.f32 %v321_v63 }
 0x2e1   :  { %2344 = vpow2.f32 %v1425_v11 }
 0x2ea   :  { %v2343_v0 = vpop.eup %2342 }
 0x2eb   :  { %v327_v2 = vmul.f32 %v2343_v0, %v2719_v54  ;;  %v2345_v13 = vpop.eup %2344 }
 0x2ec   :  { %v322_v14 = vadd.f32 1.0, %v2345_v13 }
 0x2ed   :  { %1667 = vmatmul.mubr.f32.vlgmr.msra.gmra.mrb[2].mxu1 %v327_v2 }
 0x2ee   :  { %2025 = vmatpush3.bf16.msra.mxu1 %v2614_v53  ;;  %1701 = vmatprep.mubr.msk.f32.mxu1 %vm2412_vm0, %v2410_v3  ;;  %2346 = vrcp.f32 %v322_v14 }
 0x2ef   :  { %2026 = vmatprep.subr.bf16.mxu1 %v2411_v4 }
 0x2f2   :  { %2028 = vmatpush3.bf16.msra.mxu1 %v2624_v56 }
 0x2f3   :  { %2029 = vmatprep.subr.bf16.mxu1 %v2411_v4 }
 0x2f6   :  { %2031 = vmatpush3.bf16.msra.mxu1 %v2634_v59 }
 0x2f7   :  { %2032 = vmatprep.subr.bf16.mxu1 %v2411_v4 }
 0x2f8   :  { %v2347_v24 = vpop.eup %2346 }
 0x2f9   :  { %v401_v25 = vsub.f32 1.0, %v2347_v24  ;;  %v400_v29 = vmul.f32 %v2347_v24, %v2719_v54 }
 0x2fa   :  { %2034 = vmatpush3.bf16.msra.mxu1 %v2644_v62 }
 0x2fb   :  { %2035 = vmatprep.subr.bf16.mxu1 %v2411_v4 }
 0x2fe   :  { %2037 = vmatpush3.bf16.msra.mxu1 %v2654_v1 }
 0x2ff   :  { %2038 = vmatprep.subr.bf16.mxu1 %v2411_v4 }
 0x302   :  { %2040 = vmatpush3.bf16.msra.mxu1 %v2664_v7 }
 0x303   :  { %2041 = vmatprep.subr.bf16.mxu1 %v2411_v4 }
 0x306   :  { %2043 = vmatpush3.bf16.msra.mxu1 %v2673_v12 }
 0x307   :  { %2044 = vmatprep.subr.bf16.mxu1 %v2411_v4 }
 0x30a   :  { %2046 = vmatpush3.bf16.msra.mxu1 %v2685_v17 }
 0x30b   :  { %2079 = vmatprep.subr.bf16.mxu1 %v2411_v4 }
 0x3c0   :  { %v394_v19 = vpop.f32.mrb[2].mxu1 }
 0x3c1   :  { %v398_v20 = vadd.f32 %v1423_v18, %v394_v19  ;;  %v1668_v23 = vpop.f32.mrb[3].mxu1 }
 0x3c3   :  { %2348 = vtanh.f32 %v398_v20 }
 0x3cd   :  { %v2349_v26 = vpop.eup %2348 }
 0x3ce   :  { %v402_v30 = vmul.f32 %v2349_v26, %v401_v25  ;;  %v1434_v25 = vld [vmem:[%s3047_s0 + $0x50] sm:$0xff] }
 0x3d0   :  { %v2772_v31 = vadd.f32 %v402_v30, %v400_v29 }
 0x3d2   :  { %1426 = vst [vmem:[%s3048_s4 + $0x8] sm:$0xff] %v2772_v31  ;;  %475 = vmatmul.mubr.f32.vlgmr.msra.gmra.mrb[4].mxu0 %v2772_v31 }
 0x3d3   :  { %2050 = vmatpush1.bf16.msra.mxu0 %v2460_v9  ;;  %642 = vmatprep.mubr.f32.mxu0 %v2410_v3 }
 0x3d4   :  { %2052 = vmatprep.subr.bf16.mxu0 %v2462_v10 }
 0x3d7   :  { %2054 = vmatpush1.bf16.msra.mxu0 %v2478_v15 }
 0x3d8   :  { %2056 = vmatprep.subr.bf16.mxu0 %v2481_v16 }
 0x3db   :  { %2058 = vmatpush1.bf16.msra.mxu0 %v2496_v21 }
 0x3dc   :  { %2060 = vmatprep.subr.bf16.mxu0 %v2499_v22 }
 0x3df   :  { %2062 = vmatpush1.bf16.msra.mxu0 %v2514_v27 }
 0x3e0   :  { %2064 = vmatprep.subr.bf16.mxu0 %v2517_v28 }
 0x3e3   :  { %2066 = vmatpush1.bf16.msra.mxu0 %v2532_v33 }
 0x3e4   :  { %2068 = vmatprep.subr.bf16.mxu0 %v2535_v34 }
 0x3e7   :  { %2070 = vmatpush1.bf16.msra.mxu0 %v2550_v39 }
 0x3e8   :  { %2072 = vmatprep.subr.bf16.mxu0 %v2553_v40 }
 0x3eb   :  { %2074 = vmatpush1.bf16.msra.mxu0 %v2568_v45 }
 0x3ec   :  { %2076 = vmatprep.subr.bf16.mxu0 %v2571_v46 }
 0x3ef   :  { %2078 = vmatpush1.bf16.msra.mxu0 %v2580_v49 }
 0x3f0   :  { %2104 = vmatprep.subr.bf16.mxu0 %v2449_v5 }
 0x4a5   :  { %v476_v35 = vpop.f32.mrb[4].mxu0 }
 0x4a6   :  { %v481_v36 = vadd.f32 %v1427_v32, %v476_v35  ;;  %v478_v37 = vpop.f32.mrb[5].mxu0  ;;  %v1435_v32 = vld [vmem:[%s3047_s0 + $0x58] sm:$0xff] }
 0x4a7   :  { %v482_v48 = vadd.f32 %v1428_v47, %v478_v37 }
 0x4a8   :  { %v1430_v38 = vmul.f32 -1.442695, %v481_v36 }
 0x4a9   :  { %v1431_v51 = vmul.f32 -1.442695, %v482_v48  ;;  %v1439_v48 = vld [vmem:[%s3047_s0 + $0x60] sm:$0xff] }
 0x4aa   :  { %2350 = vpow2.f32 %v1430_v38 }
 0x4b4   :  { %v2351_v41 = vpop.eup %2350 }
 0x4b5   :  { %v489_v42 = vadd.f32 1.0, %v2351_v41 }
 0x4b7   :  { %2352 = vrcp.f32 %v489_v42 }
 0x4b8   :  { %2354 = vpow2.f32 %v1431_v51 }
 0x4c1   :  { %v2353_v43 = vpop.eup %2352 }
 0x4c2   :  { %v495_v44 = vmul.f32 %v2353_v43, %v2772_v31  ;;  %v2355_v52 = vpop.eup %2354 }
 0x4c3   :  { %v490_v54 = vadd.f32 1.0, %v2355_v52 }
 0x4c4   :  { %1702 = vmatmul.mubr.f32.vlgmr.msra.gmra.mrb[4].mxu1 %v495_v44 }
 0x4c5   :  { %2081 = vmatpush3.bf16.msra.mxu1 %v2614_v53  ;;  %1736 = vmatprep.mubr.msk.f32.mxu1 %vm2412_vm0, %v2410_v3  ;;  %2356 = vrcp.f32 %v490_v54 }
 0x4c6   :  { %2082 = vmatprep.subr.bf16.mxu1 %v2411_v4 }
 0x4c9   :  { %2084 = vmatpush3.bf16.msra.mxu1 %v2624_v56 }
 0x4ca   :  { %2085 = vmatprep.subr.bf16.mxu1 %v2411_v4 }
 0x4cd   :  { %2087 = vmatpush3.bf16.msra.mxu1 %v2634_v59 }
 0x4ce   :  { %2088 = vmatprep.subr.bf16.mxu1 %v2411_v4 }
 0x4cf   :  { %v2357_v60 = vpop.eup %2356 }
 0x4d0   :  { %v569_v61 = vsub.f32 1.0, %v2357_v60  ;;  %v568_v0 = vmul.f32 %v2357_v60, %v2772_v31 }
 0x4d1   :  { %2090 = vmatpush3.bf16.msra.mxu1 %v2644_v62 }
 0x4d2   :  { %2091 = vmatprep.subr.bf16.mxu1 %v2411_v4 }
 0x4d5   :  { %2093 = vmatpush3.bf16.msra.mxu1 %v2654_v1 }
 0x4d6   :  { %2094 = vmatprep.subr.bf16.mxu1 %v2411_v4 }
 0x4d9   :  { %2096 = vmatpush3.bf16.msra.mxu1 %v2664_v7 }
 0x4da   :  { %2097 = vmatprep.subr.bf16.mxu1 %v2411_v4 }
 0x4dd   :  { %2099 = vmatpush3.bf16.msra.mxu1 %v2673_v12 }
 0x4de   :  { %2100 = vmatprep.subr.bf16.mxu1 %v2411_v4 }
 0x4e1   :  { %2102 = vmatpush3.bf16.msra.mxu1 %v2685_v17 }
 0x4e2   :  { %2135 = vmatprep.subr.bf16.mxu1 %v2411_v4 }
 0x597   :  { %v562_v55 = vpop.f32.mrb[4].mxu1 }
 0x598   :  { %v566_v57 = vadd.f32 %v1429_v50, %v562_v55  ;;  %v1703_v58 = vpop.f32.mrb[5].mxu1 }
 0x59a   :  { %2358 = vtanh.f32 %v566_v57 }
 0x5a4   :  { %v2359_v63 = vpop.eup %2358 }
 0x5a5   :  { %v570_v2 = vmul.f32 %v2359_v63, %v569_v61  ;;  %v1440_v61 = vld [vmem:[%s3047_s0 + $0x68] sm:$0xff] }
 0x5a7   :  { %v2825_v6 = vadd.f32 %v570_v2, %v568_v0 }
 0x5a9   :  { %1432 = vst [vmem:[%s3048_s4 + $0x10] sm:$0xff] %v2825_v6  ;;  %643 = vmatmul.mubr.f32.vlgmr.msra.gmra.mrb[6].mxu0 %v2825_v6 }
 0x5aa   :  { %2106 = vmatpush1.bf16.msra.mxu0 %v2460_v9  ;;  %810 = vmatprep.mubr.f32.mxu0 %v2410_v3 }
 0x5ab   :  { %2108 = vmatprep.subr.bf16.mxu0 %v2462_v10 }
 0x5ae   :  { %2110 = vmatpush1.bf16.msra.mxu0 %v2478_v15 }
 0x5af   :  { %2112 = vmatprep.subr.bf16.mxu0 %v2481_v16 }
 0x5b2   :  { %2114 = vmatpush1.bf16.msra.mxu0 %v2496_v21 }
 0x5b3   :  { %2116 = vmatprep.subr.bf16.mxu0 %v2499_v22 }
 0x5b6   :  { %2118 = vmatpush1.bf16.msra.mxu0 %v2514_v27 }
 0x5b7   :  { %2120 = vmatprep.subr.bf16.mxu0 %v2517_v28 }
 0x5ba   :  { %2122 = vmatpush1.bf16.msra.mxu0 %v2532_v33 }
 0x5bb   :  { %2124 = vmatprep.subr.bf16.mxu0 %v2535_v34 }
 0x5be   :  { %2126 = vmatpush1.bf16.msra.mxu0 %v2550_v39 }
 0x5bf   :  { %2128 = vmatprep.subr.bf16.mxu0 %v2553_v40 }
 0x5c2   :  { %2130 = vmatpush1.bf16.msra.mxu0 %v2568_v45 }
 0x5c3   :  { %2132 = vmatprep.subr.bf16.mxu0 %v2571_v46 }
 0x5c6   :  { %2134 = vmatpush1.bf16.msra.mxu0 %v2580_v49 }
 0x5c7   :  { %2160 = vmatprep.subr.bf16.mxu0 %v2449_v5 }
 0x67c   :  { %v644_v11 = vpop.f32.mrb[6].mxu0 }
 0x67d   :  { %v649_v13 = vadd.f32 %v1433_v8, %v644_v11  ;;  %v646_v14 = vpop.f32.mrb[7].mxu0  ;;  %v1441_v8 = vld [vmem:[%s3047_s0 + $0x70] sm:$0xff] }
 0x67e   :  { %v650_v26 = vadd.f32 %v1434_v25, %v646_v14 }
 0x67f   :  { %v1436_v18 = vmul.f32 -1.442695, %v649_v13 }
 0x680   :  { %v1437_v29 = vmul.f32 -1.442695, %v650_v26  ;;  %v1445_v26 = vld [vmem:[%s3047_s0 + $0x78] sm:$0xff] }
 0x681   :  { %2360 = vpow2.f32 %v1436_v18 }
 0x68b   :  { %v2361_v19 = vpop.eup %2360 }
 0x68c   :  { %v657_v20 = vadd.f32 1.0, %v2361_v19 }
 0x68e   :  { %2362 = vrcp.f32 %v657_v20 }
 0x68f   :  { %2364 = vpow2.f32 %v1437_v29 }
 0x698   :  { %v2363_v23 = vpop.eup %2362 }
 0x699   :  { %v663_v24 = vmul.f32 %v2363_v23, %v2825_v6  ;;  %v2365_v30 = vpop.eup %2364 }
 0x69a   :  { %v658_v31 = vadd.f32 1.0, %v2365_v30 }
 0x69b   :  { %1737 = vmatmul.mubr.f32.vlgmr.msra.gmra.mrb[6].mxu1 %v663_v24 }
 0x69c   :  { %2137 = vmatpush3.bf16.msra.mxu1 %v2614_v53  ;;  %1771 = vmatprep.mubr.msk.f32.mxu1 %vm2412_vm0, %v2410_v3  ;;  %2366 = vrcp.f32 %v658_v31 }
 0x69d   :  { %2138 = vmatprep.subr.bf16.mxu1 %v2411_v4 }
 0x6a0   :  { %2140 = vmatpush3.bf16.msra.mxu1 %v2624_v56 }
 0x6a1   :  { %2141 = vmatprep.subr.bf16.mxu1 %v2411_v4 }
 0x6a4   :  { %2143 = vmatpush3.bf16.msra.mxu1 %v2634_v59 }
 0x6a5   :  { %2144 = vmatprep.subr.bf16.mxu1 %v2411_v4 }
 0x6a6   :  { %v2367_v38 = vpop.eup %2366 }
 0x6a7   :  { %v737_v41 = vsub.f32 1.0, %v2367_v38  ;;  %v736_v43 = vmul.f32 %v2367_v38, %v2825_v6 }
 0x6a8   :  { %2146 = vmatpush3.bf16.msra.mxu1 %v2644_v62 }
 0x6a9   :  { %2147 = vmatprep.subr.bf16.mxu1 %v2411_v4 }
 0x6ac   :  { %2149 = vmatpush3.bf16.msra.mxu1 %v2654_v1 }
 0x6ad   :  { %2150 = vmatprep.subr.bf16.mxu1 %v2411_v4 }
 0x6b0   :  { %2152 = vmatpush3.bf16.msra.mxu1 %v2664_v7 }
 0x6b1   :  { %2153 = vmatprep.subr.bf16.mxu1 %v2411_v4 }
 0x6b4   :  { %2155 = vmatpush3.bf16.msra.mxu1 %v2673_v12 }
 0x6b5   :  { %2156 = vmatprep.subr.bf16.mxu1 %v2411_v4 }
 0x6b8   :  { %2158 = vmatpush3.bf16.msra.mxu1 %v2685_v17 }
 0x6b9   :  { %2191 = vmatprep.subr.bf16.mxu1 %v2411_v4 }
 0x76e   :  { %v730_v35 = vpop.f32.mrb[6].mxu1 }
 0x76f   :  { %v734_v36 = vadd.f32 %v1435_v32, %v730_v35  ;;  %v1738_v37 = vpop.f32.mrb[7].mxu1 }
 0x771   :  { %2368 = vtanh.f32 %v734_v36 }
 0x77b   :  { %v2369_v42 = vpop.eup %2368 }
 0x77c   :  { %v738_v44 = vmul.f32 %v2369_v42, %v737_v41 }
 0x77e   :  { %v2878_v47 = vadd.f32 %v738_v44, %v736_v43 }
 0x780   :  { %1438 = vst [vmem:[%s3048_s4 + $0x18] sm:$0xff] %v2878_v47  ;;  %811 = vmatmul.mubr.f32.vlgmr.msra.gmra.mrb[8].mxu0 %v2878_v47 }
 0x781   :  { %2162 = vmatpush1.bf16.msra.mxu0 %v2460_v9  ;;  %978 = vmatprep.mubr.f32.mxu0 %v2410_v3 }
 0x782   :  { %2164 = vmatprep.subr.bf16.mxu0 %v2462_v10 }
 0x785   :  { %2166 = vmatpush1.bf16.msra.mxu0 %v2478_v15 }
 0x786   :  { %2168 = vmatprep.subr.bf16.mxu0 %v2481_v16 }
 0x789   :  { %2170 = vmatpush1.bf16.msra.mxu0 %v2496_v21 }
 0x78a   :  { %2172 = vmatprep.subr.bf16.mxu0 %v2499_v22 }
 0x78d   :  { %2174 = vmatpush1.bf16.msra.mxu0 %v2514_v27 }
 0x78e   :  { %2176 = vmatprep.subr.bf16.mxu0 %v2517_v28 }
 0x791   :  { %2178 = vmatpush1.bf16.msra.mxu0 %v2532_v33 }
 0x792   :  { %2180 = vmatprep.subr.bf16.mxu0 %v2535_v34 }
 0x795   :  { %2182 = vmatpush1.bf16.msra.mxu0 %v2550_v39 }
 0x796   :  { %2184 = vmatprep.subr.bf16.mxu0 %v2553_v40 }
 0x799   :  { %2186 = vmatpush1.bf16.msra.mxu0 %v2568_v45 }
 0x79a   :  { %2188 = vmatprep.subr.bf16.mxu0 %v2571_v46 }
 0x79d   :  { %2190 = vmatpush1.bf16.msra.mxu0 %v2580_v49 }
 0x79e   :  { %2216 = vmatprep.subr.bf16.mxu0 %v2449_v5 }
 0x853   :  { %v812_v51 = vpop.f32.mrb[8].mxu0 }
 0x854   :  { %v817_v52 = vadd.f32 %v1439_v48, %v812_v51  ;;  %v814_v54 = vpop.f32.mrb[9].mxu0 }
 0x855   :  { %v818_v63 = vadd.f32 %v1440_v61, %v814_v54 }
 0x856   :  { %v1442_v50 = vmul.f32 -1.442695, %v817_v52 }
 0x857   :  { %v1443_v0 = vmul.f32 -1.442695, %v818_v63 }
 0x858   :  { %2370 = vpow2.f32 %v1442_v50 }
 0x862   :  { %v2371_v55 = vpop.eup %2370 }
 0x863   :  { %v825_v57 = vadd.f32 1.0, %v2371_v55 }
 0x865   :  { %2372 = vrcp.f32 %v825_v57 }
 0x866   :  { %2374 = vpow2.f32 %v1443_v0 }
 0x86f   :  { %v2373_v58 = vpop.eup %2372 }
 0x870   :  { %v831_v60 = vmul.f32 %v2373_v58, %v2878_v47  ;;  %v2375_v2 = vpop.eup %2374 }
 0x871   :  { %v826_v6 = vadd.f32 1.0, %v2375_v2 }
 0x872   :  { %1772 = vmatmul.mubr.f32.vlgmr.msra.gmra.mrb[8].mxu1 %v831_v60 }
 0x873   :  { %2193 = vmatpush3.bf16.msra.mxu1 %v2614_v53  ;;  %1806 = vmatprep.mubr.msk.f32.mxu1 %vm2412_vm0, %v2410_v3  ;;  %2376 = vrcp.f32 %v826_v6 }
 0x874   :  { %2194 = vmatprep.subr.bf16.mxu1 %v2411_v4 }
 0x877   :  { %2196 = vmatpush3.bf16.msra.mxu1 %v2624_v56 }
 0x878   :  { %2197 = vmatprep.subr.bf16.mxu1 %v2411_v4 }
 0x87b   :  { %2199 = vmatpush3.bf16.msra.mxu1 %v2634_v59 }
 0x87c   :  { %2200 = vmatprep.subr.bf16.mxu1 %v2411_v4 }
 0x87d   :  { %v2377_v18 = vpop.eup %2376 }
 0x87e   :  { %v905_v19 = vsub.f32 1.0, %v2377_v18  ;;  %v904_v23 = vmul.f32 %v2377_v18, %v2878_v47  ;;  %v1447_v47 = vld [vmem:[%s3047_s0 + $0x88] sm:$0xff] }
 0x87f   :  { %2202 = vmatpush3.bf16.msra.mxu1 %v2644_v62 }
 0x880   :  { %2203 = vmatprep.subr.bf16.mxu1 %v2411_v4 }
 0x883   :  { %2205 = vmatpush3.bf16.msra.mxu1 %v2654_v1 }
 0x884   :  { %2206 = vmatprep.subr.bf16.mxu1 %v2411_v4 }
 0x887   :  { %2208 = vmatpush3.bf16.msra.mxu1 %v2664_v7 }
 0x888   :  { %2209 = vmatprep.subr.bf16.mxu1 %v2411_v4 }
 0x88b   :  { %2211 = vmatpush3.bf16.msra.mxu1 %v2673_v12 }
 0x88c   :  { %2212 = vmatprep.subr.bf16.mxu1 %v2411_v4 }
 0x88f   :  { %2214 = vmatpush3.bf16.msra.mxu1 %v2685_v17 }
 0x890   :  { %2247 = vmatprep.subr.bf16.mxu1 %v2411_v4 }
 0x945   :  { %v898_v11 = vpop.f32.mrb[8].mxu1 }
 0x946   :  { %v902_v13 = vadd.f32 %v1441_v8, %v898_v11  ;;  %v1773_v14 = vpop.f32.mrb[9].mxu1 }
 0x947   :  { %v1458_v14 = vld [vmem:[%s3047_s0 + $0xb0] sm:$0xff] }
 0x948   :  { %2378 = vtanh.f32 %v902_v13 }
 0x952   :  { %v2379_v20 = vpop.eup %2378 }
 0x953   :  { %v906_v24 = vmul.f32 %v2379_v20, %v905_v19 }
 0x955   :  { %v2931_v25 = vadd.f32 %v906_v24, %v904_v23  ;;  %v1459_v24 = vld [vmem:[%s3047_s0 + $0xb8] sm:$0xff] }
 0x957   :  { %1444 = vst [vmem:[%s3048_s4 + $0x20] sm:$0xff] %v2931_v25  ;;  %979 = vmatmul.mubr.f32.vlgmr.msra.gmra.mrb[10].mxu0 %v2931_v25 }
 0x958   :  { %2218 = vmatpush1.bf16.msra.mxu0 %v2460_v9  ;;  %1146 = vmatprep.mubr.f32.mxu0 %v2410_v3 }
 0x959   :  { %2220 = vmatprep.subr.bf16.mxu0 %v2462_v10 }
 0x95c   :  { %2222 = vmatpush1.bf16.msra.mxu0 %v2478_v15 }
 0x95d   :  { %2224 = vmatprep.subr.bf16.mxu0 %v2481_v16 }
 0x960   :  { %2226 = vmatpush1.bf16.msra.mxu0 %v2496_v21 }
 0x961   :  { %2228 = vmatprep.subr.bf16.mxu0 %v2499_v22 }
 0x964   :  { %2230 = vmatpush1.bf16.msra.mxu0 %v2514_v27 }
 0x965   :  { %2232 = vmatprep.subr.bf16.mxu0 %v2517_v28 }
 0x968   :  { %2234 = vmatpush1.bf16.msra.mxu0 %v2532_v33 }
 0x969   :  { %2236 = vmatprep.subr.bf16.mxu0 %v2535_v34 }
 0x96c   :  { %2238 = vmatpush1.bf16.msra.mxu0 %v2550_v39 }
 0x96d   :  { %2240 = vmatprep.subr.bf16.mxu0 %v2553_v40 }
 0x970   :  { %2242 = vmatpush1.bf16.msra.mxu0 %v2568_v45 }
 0x971   :  { %2244 = vmatprep.subr.bf16.mxu0 %v2571_v46 }
 0x974   :  { %2246 = vmatpush1.bf16.msra.mxu0 %v2580_v49 }
 0x975   :  { %2272 = vmatprep.subr.bf16.mxu0 %v2449_v5  ;;  %v1446_v5 = vld [vmem:[%s3047_s0 + $0x80] sm:$0xff] }
 0xa2a   :  { %v980_v29 = vpop.f32.mrb[10].mxu0 }
 0xa2b   :  { %v985_v30 = vadd.f32 %v1445_v26, %v980_v29  ;;  %v982_v31 = vpop.f32.mrb[11].mxu0 }
 0xa2c   :  { %v986_v41 = vadd.f32 %v1446_v5, %v982_v31 }
 0xa2d   :  { %v1448_v32 = vmul.f32 -1.442695, %v985_v30 }
 0xa2e   :  { %v1449_v42 = vmul.f32 -1.442695, %v986_v41 }
 0xa2f   :  { %2380 = vpow2.f32 %v1448_v32 }
 0xa39   :  { %v2381_v35 = vpop.eup %2380 }
 0xa3a   :  { %v993_v36 = vadd.f32 1.0, %v2381_v35 }
 0xa3c   :  { %2382 = vrcp.f32 %v993_v36 }
 0xa3d   :  { %2384 = vpow2.f32 %v1449_v42 }
 0xa46   :  { %v2383_v37 = vpop.eup %2382 }
 0xa47   :  { %v999_v38 = vmul.f32 %v2383_v37, %v2931_v25  ;;  %v2385_v43 = vpop.eup %2384 }
 0xa48   :  { %v994_v44 = vadd.f32 1.0, %v2385_v43 }
 0xa49   :  { %1807 = vmatmul.mubr.f32.vlgmr.msra.gmra.mrb[10].mxu1 %v999_v38 }
 0xa4a   :  { %2249 = vmatpush3.bf16.msra.mxu1 %v2614_v53  ;;  %1841 = vmatprep.mubr.msk.f32.mxu1 %vm2412_vm0, %v2410_v3  ;;  %2386 = vrcp.f32 %v994_v44 }
 0xa4b   :  { %2250 = vmatprep.subr.bf16.mxu1 %v2411_v4 }
 0xa4e   :  { %2252 = vmatpush3.bf16.msra.mxu1 %v2624_v56 }
 0xa4f   :  { %2253 = vmatprep.subr.bf16.mxu1 %v2411_v4 }
 0xa52   :  { %2255 = vmatpush3.bf16.msra.mxu1 %v2634_v59 }
 0xa53   :  { %2256 = vmatprep.subr.bf16.mxu1 %v2411_v4 }
 0xa54   :  { %v2387_v54 = vpop.eup %2386 }
 0xa55   :  { %v1073_v50 = vsub.f32 1.0, %v2387_v54  ;;  %v1072_v57 = vmul.f32 %v2387_v54, %v2931_v25 }
 0xa56   :  { %2258 = vmatpush3.bf16.msra.mxu1 %v2644_v62 }
 0xa57   :  { %2259 = vmatprep.subr.bf16.mxu1 %v2411_v4 }
 0xa5a   :  { %2261 = vmatpush3.bf16.msra.mxu1 %v2654_v1 }
 0xa5b   :  { %2262 = vmatprep.subr.bf16.mxu1 %v2411_v4 }
 0xa5e   :  { %2264 = vmatpush3.bf16.msra.mxu1 %v2664_v7 }
 0xa5f   :  { %2265 = vmatprep.subr.bf16.mxu1 %v2411_v4 }
 0xa62   :  { %2267 = vmatpush3.bf16.msra.mxu1 %v2673_v12 }
 0xa63   :  { %2268 = vmatprep.subr.bf16.mxu1 %v2411_v4 }
 0xa66   :  { %2270 = vmatpush3.bf16.msra.mxu1 %v2685_v17 }
 0xa67   :  { %2303 = vmatprep.subr.bf16.mxu1 %v2411_v4 }
 0xb1c   :  { %v1066_v48 = vpop.f32.mrb[10].mxu1 }
 0xb1d   :  { %v1070_v51 = vadd.f32 %v1447_v47, %v1066_v48  ;;  %v1808_v52 = vpop.f32.mrb[11].mxu1 }
 0xb1f   :  { %2388 = vtanh.f32 %v1070_v51 }
 0xb29   :  { %v2389_v55 = vpop.eup %2388 }
 0xb2a   :  { %v1074_v58 = vmul.f32 %v2389_v55, %v1073_v50 }
 0xb2c   :  { %v1075_v60 = vadd.f32 %v1074_v58, %v1072_v57 }
 0xb2e   :  { %1450 = vst [vmem:[%s3048_s4 + $0x28] sm:$0xff] %v1075_v60  ;;  %1147 = vmatmul.mubr.f32.vlgmr.msra.gmra.mrb[12].mxu0 %v1075_v60 }
 0xb2f   :  { %2274 = vmatpush1.bf16.msra.mxu0 %v2460_v9  ;;  %1314 = vmatprep.mubr.f32.mxu0 %v2410_v3  ;;  %v1451_v9 = vld [vmem:[%s3047_s0 + $0x90] sm:$0xff] }
 0xb30   :  { %2276 = vmatprep.subr.bf16.mxu0 %v2462_v10 }
 0xb33   :  { %2278 = vmatpush1.bf16.msra.mxu0 %v2478_v15 }
 0xb34   :  { %2280 = vmatprep.subr.bf16.mxu0 %v2481_v16 }
 0xb37   :  { %2282 = vmatpush1.bf16.msra.mxu0 %v2496_v21 }
 0xb38   :  { %2284 = vmatprep.subr.bf16.mxu0 %v2499_v22 }
 0xb3b   :  { %2286 = vmatpush1.bf16.msra.mxu0 %v2514_v27 }
 0xb3c   :  { %2288 = vmatprep.subr.bf16.mxu0 %v2517_v28 }
 0xb3f   :  { %2290 = vmatpush1.bf16.msra.mxu0 %v2532_v33 }
 0xb40   :  { %2292 = vmatprep.subr.bf16.mxu0 %v2535_v34 }
 0xb43   :  { %2294 = vmatpush1.bf16.msra.mxu0 %v2550_v39 }
 0xb44   :  { %2296 = vmatprep.subr.bf16.mxu0 %v2553_v40 }
 0xb47   :  { %2298 = vmatpush1.bf16.msra.mxu0 %v2568_v45 }
 0xb48   :  { %2300 = vmatprep.subr.bf16.mxu0 %v2571_v46  ;;  %v1453_v46 = vld [vmem:[%s3047_s0 + $0xa0] sm:$0xff] }
 0xb4b   :  { %2302 = vmatpush1.bf16.msra.mxu0 %v2580_v49 }
 0xc01   :  { %v1148_v10 = vpop.f32.mrb[12].mxu0 }
 0xc02   :  { %v1153_v15 = vadd.f32 %v1451_v9, %v1148_v10  ;;  %v1150_v16 = vpop.f32.mrb[13].mxu0 }
 0xc04   :  { %v1454_v21 = vmul.f32 -1.442695, %v1153_v15 }
 0xc06   :  { %2390 = vpow2.f32 %v1454_v21 }
 0xc10   :  { %v2391_v22 = vpop.eup %2390 }
 0xc11   :  { %v1161_v27 = vadd.f32 1.0, %v2391_v22 }
 0xc13   :  { %2392 = vrcp.f32 %v1161_v27 }
 0xc1d   :  { %v2393_v28 = vpop.eup %2392 }
 0xc1e   :  { %v1167_v33 = vmul.f32 %v2393_v28, %v1075_v60 }
 0xc20   :  { %1842 = vmatmul.mubr.f32.vlgmr.msra.gmra.mrb[12].mxu1 %v1167_v33 }
 0xc21   :  { %2305 = vmatpush3.bf16.msra.mxu1 %v2614_v53  ;;  %1876 = vmatprep.mubr.msk.f32.mxu1 %vm2412_vm0, %v2410_v3  ;;  %v1452_v3 = vld [vmem:[%s3047_s0 + $0x98] sm:$0xff] }
 0xc22   :  { %2306 = vmatprep.subr.bf16.mxu1 %v2411_v4  ;;  %v1154_v34 = vadd.f32 %v1452_v3, %v1150_v16 }
 0xc24   :  { %v1455_v39 = vmul.f32 -1.442695, %v1154_v34 }
 0xc25   :  { %2308 = vmatpush3.bf16.msra.mxu1 %v2624_v56 }
 0xc26   :  { %2309 = vmatprep.subr.bf16.mxu1 %v2411_v4  ;;  %2394 = vpow2.f32 %v1455_v39 }
 0xc29   :  { %2311 = vmatpush3.bf16.msra.mxu1 %v2634_v59 }
 0xc2a   :  { %2312 = vmatprep.subr.bf16.mxu1 %v2411_v4 }
 0xc2d   :  { %2314 = vmatpush3.bf16.msra.mxu1 %v2644_v62 }
 0xc2e   :  { %2315 = vmatprep.subr.bf16.mxu1 %v2411_v4 }
 0xc30   :  { %v2395_v40 = vpop.eup %2394 }
 0xc31   :  { %2317 = vmatpush3.bf16.msra.mxu1 %v2654_v1  ;;  %v1162_v45 = vadd.f32 1.0, %v2395_v40 }
 0xc32   :  { %2318 = vmatprep.subr.bf16.mxu1 %v2411_v4 }
 0xc33   :  { %2396 = vrcp.f32 %v1162_v45 }
 0xc35   :  { %2320 = vmatpush3.bf16.msra.mxu1 %v2664_v7 }
 0xc36   :  { %2321 = vmatprep.subr.bf16.mxu1 %v2411_v4 }
 0xc39   :  { %2323 = vmatpush3.bf16.msra.mxu1 %v2673_v12 }
 0xc3a   :  { %2324 = vmatprep.subr.bf16.mxu1 %v2411_v4 }
 0xc3d   :  { %2326 = vmatpush3.bf16.msra.mxu1 %v2685_v17  ;;  %v2397_v4 = vpop.eup %2396  ;;  %v1457_v17 = vld [vmem:[%s3047_s0 + $0xa8] sm:$0xff] }
 0xc3e   :  { %v1241_v59 = vsub.f32 1.0, %v2397_v4  ;;  %v1240_v1 = vmul.f32 %v2397_v4, %v1075_v60 }
 0xcf3   :  { %v1234_v49 = vpop.f32.mrb[12].mxu1 }
 0xcf4   :  { %v1238_v53 = vadd.f32 %v1453_v46, %v1234_v49  ;;  %v1843_v56 = vpop.f32.mrb[13].mxu1 }
 0xcf6   :  { %2398 = vtanh.f32 %v1238_v53 }
 0xd00   :  { %v2399_v62 = vpop.eup %2398 }
 0xd01   :  { %v1242_v7 = vmul.f32 %v2399_v62, %v1241_v59 }
 0xd03   :  { %v1243_v12 = vadd.f32 %v1242_v7, %v1240_v1 }
 0xd05   :  { %1456 = vst [vmem:[%s3048_s4 + $0x30] sm:$0xff] %v1243_v12  ;;  %1315 = vmatmul.mubr.f32.vlgmr.msra.gmra.mrb[14].mxu0 %v1243_v12 }
 0xdd8   :  { %v1316_v61 = vpop.f32.mrb[14].mxu0 }
 0xdd9   :  { %v1321_v63 = vadd.f32 %v1457_v17, %v1316_v61  ;;  %v1318_v0 = vpop.f32.mrb[15].mxu0 }
 0xdda   :  { %v1322_v18 = vadd.f32 %v1458_v14, %v1318_v0 }
 0xddb   :  { %v1460_v2 = vmul.f32 -1.442695, %v1321_v63 }
 0xddc   :  { %v1461_v19 = vmul.f32 -1.442695, %v1322_v18 }
 0xddd   :  { %2400 = vpow2.f32 %v1460_v2 }
 0xde7   :  { %v2401_v6 = vpop.eup %2400 }
 0xde8   :  { %v1329_v8 = vadd.f32 1.0, %v2401_v6 }
 0xdea   :  { %2402 = vrcp.f32 %v1329_v8 }
 0xdeb   :  { %2404 = vpow2.f32 %v1461_v19 }
 0xdf4   :  { %v2403_v11 = vpop.eup %2402 }
 0xdf5   :  { %v1335_v13 = vmul.f32 %v2403_v11, %v1243_v12  ;;  %v2405_v20 = vpop.eup %2404 }
 0xdf6   :  { %v1330_v23 = vadd.f32 1.0, %v2405_v20 }
 0xdf7   :  { %1877 = vmatmul.mubr.f32.vlgmr.msra.gmra.mrb[14].mxu1 %v1335_v13 }
 0xdf8   :  { %2406 = vrcp.f32 %v1330_v23 }
 0xe02   :  { %v2407_v30 = vpop.eup %2406 }
 0xe03   :  { %v1409_v31 = vsub.f32 1.0, %v2407_v30  ;;  %v1408_v35 = vmul.f32 %v2407_v30, %v1243_v12 }
 0xeca   :  { %v1402_v25 = vpop.f32.mrb[14].mxu1 }
 0xecb   :  { %v1406_v26 = vadd.f32 %v1459_v24, %v1402_v25  ;;  %v1878_v29 = vpop.f32.mrb[15].mxu1 }
 0xecd   :  { %2408 = vtanh.f32 %v1406_v26 }
 0xed7   :  { %v2409_v32 = vpop.eup %2408 }
 0xed8   :  { %v1410_v36 = vmul.f32 %v2409_v32, %v1409_v31 }
 0xeda   :  { %v1411_v37 = vadd.f32 %v1410_v36, %v1408_v35 }
 0xedc   :  { %1462 = vst [vmem:[%s3048_s4 + $0x38] sm:$0xff] %v1411_v37 }

</bundles_post_ra>
